<compile_context>
chip_gen: v7x
topology: tpu7x:2x2x1
jax: 0.10.0
libtpu: 0.0.40
codegen_flags: <defaults>
</compile_context>

<pallas_src>
import jax
import jax.numpy as jnp
from jax.experimental import pallas as pl
from jax.experimental.pallas import tpu as pltpu

LN_EPS = 1e-5  # nn.LayerNorm default


def _round_up(x, m):
    return (x + m - 1) // m * m


def _choose_tile_o(o):
    # Largest 128-multiple divisor of O capped at 512 (O=2048 -> grid of 4,
    # so each v7x TensorCore gets >=2 pipelined steps); else whole O.
    for t in (512, 256, 128):
        if o % t == 0:
            return t
    return o


def _make_gcn_kernel(s_valid: int):
    """Build the GCN kernel; `s_valid` = number of real (non-padded) spatial rows."""

    def kernel(adj_ref, x_ref, gamma_ref, beta_ref, w_ref, scale_ref, out_ref):
        # adj_ref:   [B, B]          SMEM f32 (scalar reads)
        # x_ref:     [B, S_pad, C]   VMEM f32, padded spatial rows are zero
        # gamma_ref: [S_pad, C]      VMEM f32, padded rows zero
        # beta_ref:  [S_pad, C]      VMEM f32, padded rows zero
        # w_ref:     [C, TILE_O]     VMEM int8 (1x1 conv weight, transposed, quantized)
        # scale_ref: [1, TILE_O]     VMEM f32 per-output-channel dequant scale
        # out_ref:   [B, S_pad, TILE_O] VMEM f32
        B, S_pad, C = x_ref.shape
        TILE_O = out_ref.shape[-1]
        inv_n = 1.0 / float(s_valid * C)

        x = x_ref[...]

        # One-pass LayerNorm statistics per batch over the (S, C) plane.
        # Padded rows are exactly zero, so they contribute nothing to the sums;
        # inv_n uses the real element count (s_valid * C).
        # NOTE: E[x^2]-mean^2 in f32 is the standard fast form; if |mean|>>std
        # for real activations, switch to a masked two-pass variance.
        s = jnp.sum(jnp.sum(x, axis=2, keepdims=True), axis=1, keepdims=True)       # [B,1,1]
        sq = jnp.sum(jnp.sum(x * x, axis=2, keepdims=True), axis=1, keepdims=True)  # [B,1,1]
        mean = s * inv_n
        var = jnp.maximum(sq * inv_n - mean * mean, 0.0)   # biased variance (PyTorch LN)
        inv_std = jax.lax.rsqrt(var + LN_EPS)

        # Padded gamma/beta rows are zero -> padded xn rows come out exactly 0,
        # so padded matmul rows / outputs stay 0 and are sliced off in the wrapper.
        xn = (x - mean) * inv_std * gamma_ref[...][None] + beta_ref[...][None]

        # int8 weight tile -> bf16 on the VPU (HBM stream stays int8; the MXU
        # always sees bf16, so this path is identical on v5e/v6e/v7x).
        w_bf16 = w_ref[...].astype(jnp.bfloat16)

        # Single stacked MXU matmul: [B*S_pad, C] @ [C, TILE_O], bf16 in, f32 acc,
        # followed by the per-output-channel dequant scale (free VPU filler).
        xn2 = xn.reshape(B * S_pad, C).astype(jnp.bfloat16)
        tmp = jnp.dot(xn2, w_bf16, preferred_element_type=jnp.float32)
        tmp = tmp * scale_ref[...]                     # [B*S_pad, TILE_O] * [1, TILE_O]
        tmp = tmp.reshape(B, S_pad, TILE_O)

        # Residual channel slice straight out of the resident x block (C == O),
        # instead of DMA-ing x a second time tile-by-tile.
        off = pl.multiple_of(pl.program_id(0) * TILE_O, 128)
        res = x_ref[:, :, pl.ds(off, TILE_O)]

        # Adjacency batch-mix (K = B is tiny -> scalar-broadcast VPU FMAs).
        for b in range(B):
            acc = adj_ref[b, 0] * tmp[0]
            for k in range(1, B):
                acc = acc + adj_ref[b, k] * tmp[k]
            out_ref[b] = acc + res[b]

    return kernel


def prepare_gcn_params(gamma_chw, beta_chw, conv_w_oc):
    """One-time parameter prep (layout + dtype + quantization), hoisted out of
    the forward path.

    gamma_chw, beta_chw: [C, H, W] LayerNorm affine params.
    conv_w_oc:           [O, C]    1x1 conv weight (kernel dims squeezed).
    Returns:
      gamma_sc, beta_sc: zero-padded [S_pad, C] f32 (S_pad = H*W rounded to 16)
      w_q_co:            [C, O] int8 symmetric per-output-channel quantized weight
      w_scale:           [1, O] f32 dequant scales
    """
    C, H, W = gamma_chw.shape
    S = H * W
    S_pad = _round_up(S, 16)   # 16: keeps the bf16 matmul LHS (16,128)-tile aligned

    def to_sc(p):
        p_sc = jnp.transpose(p, (1, 2, 0)).reshape(S, C).astype(jnp.float32)
        return jnp.pad(p_sc, ((0, S_pad - S), (0, 0)))

    gamma_sc = to_sc(gamma_chw)
    beta_sc = to_sc(beta_chw)

    # Symmetric per-output-channel int8 quantization (halves the dominant
    # weight HBM stream; dequant happens after the f32-accumulated matmul).
    w = jnp.asarray(conv_w_oc).astype(jnp.float32)             # [O, C]
    absmax = jnp.max(jnp.abs(w), axis=1, keepdims=True)        # [O, 1]
    scale = jnp.maximum(absmax, 1e-30) / 127.0
    w_q = jnp.clip(jnp.round(w / scale), -127.0, 127.0).astype(jnp.int8)
    w_q_co = jnp.transpose(w_q)                                 # [C, O] int8
    w_scale = scale.reshape(1, -1).astype(jnp.float32)          # [1, O]
    return gamma_sc, beta_sc, w_q_co, w_scale


@jax.jit
def gcn_forward(x_nchw, adj, gamma_sc, beta_sc, w_q_co, w_scale):
    """Pallas GCN forward. x_nchw: [B, C, H, W], adj: [B, B], prepped params."""
    B, C, H, W = x_nchw.shape
    S = H * W
    S_pad, C_p = gamma_sc.shape
    O = w_q_co.shape[1]
    assert C_p == C and beta_sc.shape == (S_pad, C), "gamma/beta must be padded [S_pad, C]"
    assert w_q_co.shape == (C, O) and w_scale.shape == (1, O)
    assert C == O, "residual connection requires in_features == out_features"
    TILE_O = _choose_tile_o(O)
    n_tiles = O // TILE_O

    # Per-call activation layout glue (channels-last + sublane padding).
    # TODO(synk): keep activations channels-last in the surrounding model to
    # eliminate this transpose/pad (and the reverse transpose below).
    x_bsc = jnp.transpose(x_nchw, (0, 2, 3, 1)).reshape(B, S, C).astype(jnp.float32)
    x_pad = jnp.pad(x_bsc, ((0, 0), (0, S_pad - S), (0, 0)))
    adj_f32 = adj.astype(jnp.float32)

    # Deepen the weight pipeline when the grid is deep enough (hides the
    # exposed first weight-tile DMA on single-TC chips).
    w_spec_kwargs = {}
    if n_tiles >= 3:
        w_spec_kwargs["pipeline_mode"] = pl.Buffered(3)

    out_pad = pl.pallas_call(
        _make_gcn_kernel(S),
        out_shape=jax.ShapeDtypeStruct((B, S_pad, O), jnp.float32),
        grid=(n_tiles,),
        in_specs=[
            pl.BlockSpec(memory_space=pltpu.MemorySpace.SMEM),              # adj (scalars)
            pl.BlockSpec((B, S_pad, C), lambda o: (0, 0, 0)),               # x (full: LN + residual)
            pl.BlockSpec((S_pad, C), lambda o: (0, 0)),                     # gamma
            pl.BlockSpec((S_pad, C), lambda o: (0, 0)),                     # beta
            pl.BlockSpec((C, TILE_O), lambda o: (0, o), **w_spec_kwargs),   # int8 weight tile
            pl.BlockSpec((1, TILE_O), lambda o: (0, o)),                    # dequant scale tile
        ],
        out_specs=pl.BlockSpec((B, S_pad, TILE_O), lambda o: (0, 0, o)),
        compiler_params=pltpu.CompilerParams(
            dimension_semantics=("parallel",),
            vmem_limit_bytes=48 * 1024 * 1024,
        ),
    )(adj_f32, x_pad, gamma_sc, beta_sc, w_q_co, w_scale)

    out = out_pad[:, :S, :].reshape(B, H, W, O)
    return jnp.transpose(out, (0, 3, 1, 2))


def gcn_reference(x_nchw, adj, params):
    """Pure-JAX reference reproducing the PyTorch forward exactly (f32)."""
    gamma, beta, conv_w = params
    B, C, H, W = x_nchw.shape
    xf = x_nchw.reshape(B, -1)
    mean = jnp.mean(xf, axis=1, keepdims=True)
    var = jnp.mean((xf - mean) ** 2, axis=1, keepdims=True)
    xn = ((xf - mean) / jnp.sqrt(var + LN_EPS)).reshape(B, C, H, W)
    xn = xn * gamma[None] + beta[None]
    tmp = jnp.einsum("oc,bchw->bohw", conv_w, xn)      # 1x1 conv, no bias
    mixed = jnp.einsum("bk,kohw->bohw", adj, tmp)      # adj @ tmp.view(B, -1)
    return mixed + x_nchw


if __name__ == "__main__":
    # Small shapes consistent with the module: H=W=7 fixed by LayerNorm([C,7,7]);
    # feat_dim scaled down 2048 -> 128 for a small synthetic test.
    B, C, H, W = 4, 128, 7, 7
    O = C

    key = jax.random.PRNGKey(0)
    k1, k2, k3, k4, k5 = jax.random.split(key, 5)

    x = jax.random.normal(k1, (B, C, H, W), jnp.float32)
    adj = jax.nn.softmax(jax.random.normal(k2, (B, B), jnp.float32), axis=-1)

    # Synthetic deterministic params: LN affine near default (1, 0), conv weight
    # ~ N(0, 0.01) as in reset_parameters (kaiming_normal_ std=0.01).
    gamma = 1.0 + 0.1 * jax.random.normal(k3, (C, H, W), jnp.float32)
    beta = 0.05 * jax.random.normal(k4, (C, H, W), jnp.float32)
    conv_w = 0.01 * jax.random.normal(k5, (O, C), jnp.float32)   # [O, C]

    # One-time parameter prep (pre-transposed / padded / int8-quantized) —
    # hoisted out of the forward path.
    gamma_sc, beta_sc, w_q_co, w_scale = prepare_gcn_params(gamma, beta, conv_w)

    out = gcn_forward(x, adj, gamma_sc, beta_sc, w_q_co, w_scale)
    out = jax.block_until_ready(out)

    ref = gcn_reference(x, adj, (gamma, beta, conv_w))
    assert out.shape == (B, O, H, W)
    assert bool(jnp.all(jnp.isfinite(out)))
    max_err = float(jnp.max(jnp.abs(out - ref)))
    assert bool(jnp.allclose(out, ref, rtol=2e-2, atol=2e-2)), max_err

    print("KERNEL_OK")
</pallas_src>

<mosaic_0001>
module attributes {stable_mosaic.version = 11 : i64} {
  func.func @kernel(%arg0: i32, %arg1: memref<4x4xf32, #tpu.memory_space<smem>>, %arg2: memref<4x64x128xf32, #tpu.memory_space<vmem>>, %arg3: memref<64x128xf32, #tpu.memory_space<vmem>>, %arg4: memref<64x128xf32, #tpu.memory_space<vmem>>, %arg5: memref<128x128xi8, #tpu.memory_space<vmem>>, %arg6: memref<1x128xf32, #tpu.memory_space<vmem>>, %arg7: memref<4x64x128xf32, #tpu.memory_space<vmem>>) attributes {dimension_semantics = [#tpu.dimension_semantics<parallel>], iteration_bounds = array<i64: 1>, scalar_prefetch = 0 : i64, scratch_operands = 0 : i64, tpu.core_type = #tpu.core_type<tc>, window_params = [{transform_indices = @transform_0, window_bounds = array<i64: 4, 4>}, {pipeline_mode = #tpu.pipeline_mode<synchronous>, transform_indices = @transform_1, window_bounds = array<i64: 4, 64, 128>}, {pipeline_mode = #tpu.pipeline_mode<synchronous>, transform_indices = @transform_2, window_bounds = array<i64: 64, 128>}, {pipeline_mode = #tpu.pipeline_mode<synchronous>, transform_indices = @transform_3, window_bounds = array<i64: 64, 128>}, {transform_indices = @transform_4, window_bounds = array<i64: 128, 128>}, {transform_indices = @transform_5, window_bounds = array<i64: 1, 128>}, {transform_indices = @transform_6, window_bounds = array<i64: 4, 64, 128>}]} {
    %c0 = arith.constant 0 : index
    %c0_0 = arith.constant 0 : index
    %c0_1 = arith.constant 0 : index
    %0 = vector.load %arg2[%c0, %c0_0, %c0_1] : memref<4x64x128xf32, #tpu.memory_space<vmem>>, vector<4x64x128xf32>
    %cst = arith.constant dense<0.000000e+00> : vector<4x64xf32>
    %1 = vector.multi_reduction <add>, %0, %cst [2] : vector<4x64x128xf32> to vector<4x64xf32>
    %2 = vector.shape_cast %1 : vector<4x64xf32> to vector<4x64x1xf32>
    %cst_2 = arith.constant dense<0.000000e+00> : vector<4x1xf32>
    %3 = vector.multi_reduction <add>, %2, %cst_2 [1] : vector<4x64x1xf32> to vector<4x1xf32>
    %4 = vector.shape_cast %3 : vector<4x1xf32> to vector<4x1x1xf32>
    %5 = arith.mulf %0, %0 : vector<4x64x128xf32>
    %cst_3 = arith.constant dense<0.000000e+00> : vector<4x64xf32>
    %6 = vector.multi_reduction <add>, %5, %cst_3 [2] : vector<4x64x128xf32> to vector<4x64xf32>
    %7 = vector.shape_cast %6 : vector<4x64xf32> to vector<4x64x1xf32>
    %cst_4 = arith.constant dense<0.000000e+00> : vector<4x1xf32>
    %8 = vector.multi_reduction <add>, %7, %cst_4 [1] : vector<4x64x1xf32> to vector<4x1xf32>
    %9 = vector.shape_cast %8 : vector<4x1xf32> to vector<4x1x1xf32>
    %cst_5 = arith.constant 1.59438772E-4 : f32
    %10 = vector.broadcast %cst_5 : f32 to vector<4x1x1xf32>
    %11 = arith.mulf %4, %10 : vector<4x1x1xf32>
    %cst_6 = arith.constant 1.59438772E-4 : f32
    %12 = vector.broadcast %cst_6 : f32 to vector<4x1x1xf32>
    %13 = arith.mulf %9, %12 : vector<4x1x1xf32>
    %14 = arith.mulf %11, %11 : vector<4x1x1xf32>
    %15 = arith.subf %13, %14 : vector<4x1x1xf32>
    %cst_7 = arith.constant 0.000000e+00 : f32
    %16 = vector.broadcast %cst_7 : f32 to vector<4x1x1xf32>
    %17 = arith.maximumf %15, %16 : vector<4x1x1xf32>
    %cst_8 = arith.constant 9.99999974E-6 : f32
    %18 = vector.broadcast %cst_8 : f32 to vector<4x1x1xf32>
    %19 = arith.addf %17, %18 : vector<4x1x1xf32>
    %20 = math.rsqrt %19 : vector<4x1x1xf32>
    %21 = vector.broadcast %11 : vector<4x1x1xf32> to vector<4x64x128xf32>
    %22 = arith.subf %0, %21 : vector<4x64x128xf32>
    %23 = vector.broadcast %20 : vector<4x1x1xf32> to vector<4x64x128xf32>
    %24 = arith.mulf %22, %23 : vector<4x64x128xf32>
    %c0_9 = arith.constant 0 : index
    %c0_10 = arith.constant 0 : index
    %25 = vector.load %arg3[%c0_9, %c0_10] : memref<64x128xf32, #tpu.memory_space<vmem>>, vector<64x128xf32>
    %26 = vector.shape_cast %25 : vector<64x128xf32> to vector<1x64x128xf32>
    %27 = vector.broadcast %26 : vector<1x64x128xf32> to vector<4x64x128xf32>
    %28 = arith.mulf %24, %27 : vector<4x64x128xf32>
    %c0_11 = arith.constant 0 : index
    %c0_12 = arith.constant 0 : index
    %29 = vector.load %arg4[%c0_11, %c0_12] : memref<64x128xf32, #tpu.memory_space<vmem>>, vector<64x128xf32>
    %30 = vector.shape_cast %29 : vector<64x128xf32> to vector<1x64x128xf32>
    %31 = vector.broadcast %30 : vector<1x64x128xf32> to vector<4x64x128xf32>
    %32 = arith.addf %28, %31 : vector<4x64x128xf32>
    %c0_13 = arith.constant 0 : index
    %c0_14 = arith.constant 0 : index
    %33 = vector.load %arg5[%c0_13, %c0_14] : memref<128x128xi8, #tpu.memory_space<vmem>>, vector<128x128xi8>
    %34 = arith.sitofp %33 : vector<128x128xi8> to vector<128x128xbf16>
    %35 = vector.shape_cast %32 : vector<4x64x128xf32> to vector<256x128xf32>
    %36 = arith.truncf %35 : vector<256x128xf32> to vector<256x128xbf16>
    %cst_15 = arith.constant dense<0.000000e+00> : vector<256x128xf32>
    %37 = tpu.matmul %36, %34, %cst_15 {dimension_numbers = #tpu.dot_dimension_numbers<[1], [0], [0], [1], [0, 0, 1, 1], [], []>} : vector<256x128xbf16>, vector<128x128xbf16>, vector<256x128xf32> -> vector<256x128xf32>
    %c0_16 = arith.constant 0 : index
    %c0_17 = arith.constant 0 : index
    %38 = vector.load %arg6[%c0_16, %c0_17] : memref<1x128xf32, #tpu.memory_space<vmem>>, vector<1x128xf32>
    %39 = vector.broadcast %38 : vector<1x128xf32> to vector<256x128xf32>
    %40 = arith.mulf %37, %39 : vector<256x128xf32>
    %41 = vector.shape_cast %40 : vector<256x128xf32> to vector<4x64x128xf32>
    %c128_i32 = arith.constant 128 : i32
    %42 = arith.muli %arg0, %c128_i32 : i32
    %43 = tpu.assume_multiple %42, 128 : i32
    %c0_18 = arith.constant 0 : index
    %c0_19 = arith.constant 0 : index
    %44 = arith.index_cast %43 : i32 to index
    %45 = vector.load %arg2[%c0_18, %c0_19, %44] : memref<4x64x128xf32, #tpu.memory_space<vmem>>, vector<4x64x128xf32>
    %c0_20 = arith.constant 0 : index
    %c0_21 = arith.constant 0 : index
    %46 = memref.load %arg1[%c0_20, %c0_21] : memref<4x4xf32, #tpu.memory_space<smem>>
    %47 = vector.extract_strided_slice %41 {offsets = [0, 0, 0], sizes = [1, 64, 128], strides = [1, 1, 1]} : vector<4x64x128xf32> to vector<1x64x128xf32>
    %48 = vector.shape_cast %47 : vector<1x64x128xf32> to vector<64x128xf32>
    %49 = vector.broadcast %46 : f32 to vector<64x128xf32>
    %50 = arith.mulf %49, %48 : vector<64x128xf32>
    %c0_22 = arith.constant 0 : index
    %c1 = arith.constant 1 : index
    %51 = memref.load %arg1[%c0_22, %c1] : memref<4x4xf32, #tpu.memory_space<smem>>
    %52 = vector.extract_strided_slice %41 {offsets = [1, 0, 0], sizes = [1, 64, 128], strides = [1, 1, 1]} : vector<4x64x128xf32> to vector<1x64x128xf32>
    %53 = vector.shape_cast %52 : vector<1x64x128xf32> to vector<64x128xf32>
    %54 = vector.broadcast %51 : f32 to vector<64x128xf32>
    %55 = arith.mulf %54, %53 : vector<64x128xf32>
    %56 = arith.addf %50, %55 : vector<64x128xf32>
    %c0_23 = arith.constant 0 : index
    %c2 = arith.constant 2 : index
    %57 = memref.load %arg1[%c0_23, %c2] : memref<4x4xf32, #tpu.memory_space<smem>>
    %58 = vector.extract_strided_slice %41 {offsets = [2, 0, 0], sizes = [1, 64, 128], strides = [1, 1, 1]} : vector<4x64x128xf32> to vector<1x64x128xf32>
    %59 = vector.shape_cast %58 : vector<1x64x128xf32> to vector<64x128xf32>
    %60 = vector.broadcast %57 : f32 to vector<64x128xf32>
    %61 = arith.mulf %60, %59 : vector<64x128xf32>
    %62 = arith.addf %56, %61 : vector<64x128xf32>
    %c0_24 = arith.constant 0 : index
    %c3 = arith.constant 3 : index
    %63 = memref.load %arg1[%c0_24, %c3] : memref<4x4xf32, #tpu.memory_space<smem>>
    %64 = vector.extract_strided_slice %41 {offsets = [3, 0, 0], sizes = [1, 64, 128], strides = [1, 1, 1]} : vector<4x64x128xf32> to vector<1x64x128xf32>
    %65 = vector.shape_cast %64 : vector<1x64x128xf32> to vector<64x128xf32>
    %66 = vector.broadcast %63 : f32 to vector<64x128xf32>
    %67 = arith.mulf %66, %65 : vector<64x128xf32>
    %68 = arith.addf %62, %67 : vector<64x128xf32>
    %69 = vector.extract_strided_slice %45 {offsets = [0, 0, 0], sizes = [1, 64, 128], strides = [1, 1, 1]} : vector<4x64x128xf32> to vector<1x64x128xf32>
    %70 = vector.shape_cast %69 : vector<1x64x128xf32> to vector<64x128xf32>
    %71 = arith.addf %68, %70 : vector<64x128xf32>
    %c0_25 = arith.constant 0 : index
    %c0_26 = arith.constant 0 : index
    %c0_27 = arith.constant 0 : index
    %72 = vector.load %arg7[%c0_25, %c0_26, %c0_27] : memref<4x64x128xf32, #tpu.memory_space<vmem>>, vector<1x64x128xf32>
    %73 = vector.shape_cast %72 : vector<1x64x128xf32> to vector<64x128xf32>
    %74 = vector.shape_cast %71 : vector<64x128xf32> to vector<1x64x128xf32>
    tpu.vector_store %arg7[%c0_25, %c0_26, %c0_27], %74 {strides = array<i32>} : memref<4x64x128xf32, #tpu.memory_space<vmem>>, vector<1x64x128xf32>,
    %c1_28 = arith.constant 1 : index
    %c0_29 = arith.constant 0 : index
    %75 = memref.load %arg1[%c1_28, %c0_29] : memref<4x4xf32, #tpu.memory_space<smem>>
    %76 = vector.extract_strided_slice %41 {offsets = [0, 0, 0], sizes = [1, 64, 128], strides = [1, 1, 1]} : vector<4x64x128xf32> to vector<1x64x128xf32>
    %77 = vector.shape_cast %76 : vector<1x64x128xf32> to vector<64x128xf32>
    %78 = vector.broadcast %75 : f32 to vector<64x128xf32>
    %79 = arith.mulf %78, %77 : vector<64x128xf32>
    %c1_30 = arith.constant 1 : index
    %c1_31 = arith.constant 1 : index
    %80 = memref.load %arg1[%c1_30, %c1_31] : memref<4x4xf32, #tpu.memory_space<smem>>
    %81 = vector.extract_strided_slice %41 {offsets = [1, 0, 0], sizes = [1, 64, 128], strides = [1, 1, 1]} : vector<4x64x128xf32> to vector<1x64x128xf32>
    %82 = vector.shape_cast %81 : vector<1x64x128xf32> to vector<64x128xf32>
    %83 = vector.broadcast %80 : f32 to vector<64x128xf32>
    %84 = arith.mulf %83, %82 : vector<64x128xf32>
    %85 = arith.addf %79, %84 : vector<64x128xf32>
    %c1_32 = arith.constant 1 : index
    %c2_33 = arith.constant 2 : index
    %86 = memref.load %arg1[%c1_32, %c2_33] : memref<4x4xf32, #tpu.memory_space<smem>>
    %87 = vector.extract_strided_slice %41 {offsets = [2, 0, 0], sizes = [1, 64, 128], strides = [1, 1, 1]} : vector<4x64x128xf32> to vector<1x64x128xf32>
    %88 = vector.shape_cast %87 : vector<1x64x128xf32> to vector<64x128xf32>
    %89 = vector.broadcast %86 : f32 to vector<64x128xf32>
    %90 = arith.mulf %89, %88 : vector<64x128xf32>
    %91 = arith.addf %85, %90 : vector<64x128xf32>
    %c1_34 = arith.constant 1 : index
    %c3_35 = arith.constant 3 : index
    %92 = memref.load %arg1[%c1_34, %c3_35] : memref<4x4xf32, #tpu.memory_space<smem>>
    %93 = vector.extract_strided_slice %41 {offsets = [3, 0, 0], sizes = [1, 64, 128], strides = [1, 1, 1]} : vector<4x64x128xf32> to vector<1x64x128xf32>
    %94 = vector.shape_cast %93 : vector<1x64x128xf32> to vector<64x128xf32>
    %95 = vector.broadcast %92 : f32 to vector<64x128xf32>
    %96 = arith.mulf %95, %94 : vector<64x128xf32>
    %97 = arith.addf %91, %96 : vector<64x128xf32>
    %98 = vector.extract_strided_slice %45 {offsets = [1, 0, 0], sizes = [1, 64, 128], strides = [1, 1, 1]} : vector<4x64x128xf32> to vector<1x64x128xf32>
    %99 = vector.shape_cast %98 : vector<1x64x128xf32> to vector<64x128xf32>
    %100 = arith.addf %97, %99 : vector<64x128xf32>
    %c1_36 = arith.constant 1 : index
    %c0_37 = arith.constant 0 : index
    %c0_38 = arith.constant 0 : index
    %101 = vector.load %arg7[%c1_36, %c0_37, %c0_38] : memref<4x64x128xf32, #tpu.memory_space<vmem>>, vector<1x64x128xf32>
    %102 = vector.shape_cast %101 : vector<1x64x128xf32> to vector<64x128xf32>
    %103 = vector.shape_cast %100 : vector<64x128xf32> to vector<1x64x128xf32>
    tpu.vector_store %arg7[%c1_36, %c0_37, %c0_38], %103 {strides = array<i32>} : memref<4x64x128xf32, #tpu.memory_space<vmem>>, vector<1x64x128xf32>,
    %c2_39 = arith.constant 2 : index
    %c0_40 = arith.constant 0 : index
    %104 = memref.load %arg1[%c2_39, %c0_40] : memref<4x4xf32, #tpu.memory_space<smem>>
    %105 = vector.extract_strided_slice %41 {offsets = [0, 0, 0], sizes = [1, 64, 128], strides = [1, 1, 1]} : vector<4x64x128xf32> to vector<1x64x128xf32>
    %106 = vector.shape_cast %105 : vector<1x64x128xf32> to vector<64x128xf32>
    %107 = vector.broadcast %104 : f32 to vector<64x128xf32>
    %108 = arith.mulf %107, %106 : vector<64x128xf32>
    %c2_41 = arith.constant 2 : index
    %c1_42 = arith.constant 1 : index
    %109 = memref.load %arg1[%c2_41, %c1_42] : memref<4x4xf32, #tpu.memory_space<smem>>
    %110 = vector.extract_strided_slice %41 {offsets = [1, 0, 0], sizes = [1, 64, 128], strides = [1, 1, 1]} : vector<4x64x128xf32> to vector<1x64x128xf32>
    %111 = vector.shape_cast %110 : vector<1x64x128xf32> to vector<64x128xf32>
    %112 = vector.broadcast %109 : f32 to vector<64x128xf32>
    %113 = arith.mulf %112, %111 : vector<64x128xf32>
    %114 = arith.addf %108, %113 : vector<64x128xf32>
    %c2_43 = arith.constant 2 : index
    %c2_44 = arith.constant 2 : index
    %115 = memref.load %arg1[%c2_43, %c2_44] : memref<4x4xf32, #tpu.memory_space<smem>>
    %116 = vector.extract_strided_slice %41 {offsets = [2, 0, 0], sizes = [1, 64, 128], strides = [1, 1, 1]} : vector<4x64x128xf32> to vector<1x64x128xf32>
    %117 = vector.shape_cast %116 : vector<1x64x128xf32> to vector<64x128xf32>
    %118 = vector.broadcast %115 : f32 to vector<64x128xf32>
    %119 = arith.mulf %118, %117 : vector<64x128xf32>
    %120 = arith.addf %114, %119 : vector<64x128xf32>
    %c2_45 = arith.constant 2 : index
    %c3_46 = arith.constant 3 : index
    %121 = memref.load %arg1[%c2_45, %c3_46] : memref<4x4xf32, #tpu.memory_space<smem>>
    %122 = vector.extract_strided_slice %41 {offsets = [3, 0, 0], sizes = [1, 64, 128], strides = [1, 1, 1]} : vector<4x64x128xf32> to vector<1x64x128xf32>
    %123 = vector.shape_cast %122 : vector<1x64x128xf32> to vector<64x128xf32>
    %124 = vector.broadcast %121 : f32 to vector<64x128xf32>
    %125 = arith.mulf %124, %123 : vector<64x128xf32>
    %126 = arith.addf %120, %125 : vector<64x128xf32>
    %127 = vector.extract_strided_slice %45 {offsets = [2, 0, 0], sizes = [1, 64, 128], strides = [1, 1, 1]} : vector<4x64x128xf32> to vector<1x64x128xf32>
    %128 = vector.shape_cast %127 : vector<1x64x128xf32> to vector<64x128xf32>
    %129 = arith.addf %126, %128 : vector<64x128xf32>
    %c2_47 = arith.constant 2 : index
    %c0_48 = arith.constant 0 : index
    %c0_49 = arith.constant 0 : index
    %130 = vector.load %arg7[%c2_47, %c0_48, %c0_49] : memref<4x64x128xf32, #tpu.memory_space<vmem>>, vector<1x64x128xf32>
    %131 = vector.shape_cast %130 : vector<1x64x128xf32> to vector<64x128xf32>
    %132 = vector.shape_cast %129 : vector<64x128xf32> to vector<1x64x128xf32>
    tpu.vector_store %arg7[%c2_47, %c0_48, %c0_49], %132 {strides = array<i32>} : memref<4x64x128xf32, #tpu.memory_space<vmem>>, vector<1x64x128xf32>,
    %c3_50 = arith.constant 3 : index
    %c0_51 = arith.constant 0 : index
    %133 = memref.load %arg1[%c3_50, %c0_51] : memref<4x4xf32, #tpu.memory_space<smem>>
    %134 = vector.extract_strided_slice %41 {offsets = [0, 0, 0], sizes = [1, 64, 128], strides = [1, 1, 1]} : vector<4x64x128xf32> to vector<1x64x128xf32>
    %135 = vector.shape_cast %134 : vector<1x64x128xf32> to vector<64x128xf32>
    %136 = vector.broadcast %133 : f32 to vector<64x128xf32>
    %137 = arith.mulf %136, %135 : vector<64x128xf32>
    %c3_52 = arith.constant 3 : index
    %c1_53 = arith.constant 1 : index
    %138 = memref.load %arg1[%c3_52, %c1_53] : memref<4x4xf32, #tpu.memory_space<smem>>
    %139 = vector.extract_strided_slice %41 {offsets = [1, 0, 0], sizes = [1, 64, 128], strides = [1, 1, 1]} : vector<4x64x128xf32> to vector<1x64x128xf32>
    %140 = vector.shape_cast %139 : vector<1x64x128xf32> to vector<64x128xf32>
    %141 = vector.broadcast %138 : f32 to vector<64x128xf32>
    %142 = arith.mulf %141, %140 : vector<64x128xf32>
    %143 = arith.addf %137, %142 : vector<64x128xf32>
    %c3_54 = arith.constant 3 : index
    %c2_55 = arith.constant 2 : index
    %144 = memref.load %arg1[%c3_54, %c2_55] : memref<4x4xf32, #tpu.memory_space<smem>>
    %145 = vector.extract_strided_slice %41 {offsets = [2, 0, 0], sizes = [1, 64, 128], strides = [1, 1, 1]} : vector<4x64x128xf32> to vector<1x64x128xf32>
    %146 = vector.shape_cast %145 : vector<1x64x128xf32> to vector<64x128xf32>
    %147 = vector.broadcast %144 : f32 to vector<64x128xf32>
    %148 = arith.mulf %147, %146 : vector<64x128xf32>
    %149 = arith.addf %143, %148 : vector<64x128xf32>
    %c3_56 = arith.constant 3 : index
    %c3_57 = arith.constant 3 : index
    %150 = memref.load %arg1[%c3_56, %c3_57] : memref<4x4xf32, #tpu.memory_space<smem>>
    %151 = vector.extract_strided_slice %41 {offsets = [3, 0, 0], sizes = [1, 64, 128], strides = [1, 1, 1]} : vector<4x64x128xf32> to vector<1x64x128xf32>
    %152 = vector.shape_cast %151 : vector<1x64x128xf32> to vector<64x128xf32>
    %153 = vector.broadcast %150 : f32 to vector<64x128xf32>
    %154 = arith.mulf %153, %152 : vector<64x128xf32>
    %155 = arith.addf %149, %154 : vector<64x128xf32>
    %156 = vector.extract_strided_slice %45 {offsets = [3, 0, 0], sizes = [1, 64, 128], strides = [1, 1, 1]} : vector<4x64x128xf32> to vector<1x64x128xf32>
    %157 = vector.shape_cast %156 : vector<1x64x128xf32> to vector<64x128xf32>
    %158 = arith.addf %155, %157 : vector<64x128xf32>
    %c3_58 = arith.constant 3 : index
    %c0_59 = arith.constant 0 : index
    %c0_60 = arith.constant 0 : index
    %159 = vector.load %arg7[%c3_58, %c0_59, %c0_60] : memref<4x64x128xf32, #tpu.memory_space<vmem>>, vector<1x64x128xf32>
    %160 = vector.shape_cast %159 : vector<1x64x128xf32> to vector<64x128xf32>
    %161 = vector.shape_cast %158 : vector<64x128xf32> to vector<1x64x128xf32>
    tpu.vector_store %arg7[%c3_58, %c0_59, %c0_60], %161 {strides = array<i32>} : memref<4x64x128xf32, #tpu.memory_space<vmem>>, vector<1x64x128xf32>,
    return
  }
  func.func @transform_0(%arg0: i32) -> (i32, i32) {
    %c0_i32 = arith.constant 0 : i32
    %c0_i32_0 = arith.constant 0 : i32
    %c0_i32_1 = arith.constant 0 : i32
    return %c0_i32, %c0_i32_0 : i32, i32
  }
  func.func @transform_1(%arg0: i32) -> (i32, i32, i32) {
    %c0_i32 = arith.constant 0 : i32
    %c0_i32_0 = arith.constant 0 : i32
    %c0_i32_1 = arith.constant 0 : i32
    %c0_i32_2 = arith.constant 0 : i32
    return %c0_i32, %c0_i32_0, %c0_i32_1 : i32, i32, i32
  }
  func.func @transform_2(%arg0: i32) -> (i32, i32) {
    %c0_i32 = arith.constant 0 : i32
    %c0_i32_0 = arith.constant 0 : i32
    %c0_i32_1 = arith.constant 0 : i32
    return %c0_i32, %c0_i32_0 : i32, i32
  }
  func.func @transform_3(%arg0: i32) -> (i32, i32) {
    %c0_i32 = arith.constant 0 : i32
    %c0_i32_0 = arith.constant 0 : i32
    %c0_i32_1 = arith.constant 0 : i32
    return %c0_i32, %c0_i32_0 : i32, i32
  }
  func.func @transform_4(%arg0: i32) -> (i32, i32) {
    %c0_i32 = arith.constant 0 : i32
    %c0_i32_0 = arith.constant 0 : i32
    return %c0_i32, %arg0 : i32, i32
  }
  func.func @transform_5(%arg0: i32) -> (i32, i32) {
    %c0_i32 = arith.constant 0 : i32
    %c0_i32_0 = arith.constant 0 : i32
    return %c0_i32, %arg0 : i32, i32
  }
  func.func @transform_6(%arg0: i32) -> (i32, i32, i32) {
    %c0_i32 = arith.constant 0 : i32
    %c0_i32_0 = arith.constant 0 : i32
    %c0_i32_1 = arith.constant 0 : i32
    return %c0_i32, %c0_i32_0, %arg0 : i32, i32, i32
  }
}

</mosaic_0001>

<bundles_post_ra>
// kernel: gcn_forward.1
= control target key start
LH: loop header
LB: loop body
LE: loop exit
PB: predicated region body
PF: predicated region fallthrough
CT: control target
= control target key end

     0   :  { %11 = vsyncpa [#allocation3], 0  ;;  %s2489_s0 = inlined_call_operand.vmem [shape: f32[4,4], index: 0, kind: input, shape index: {}]   ;;  %s2490_s1 = inlined_call_operand.vmem [shape: f32[4,64,128], index: 1, kind: input, shape index: {}]   ;;  %s2491_s2 = inlined_call_operand.vmem [shape: f32[64,128], index: 2, kind: input, shape index: {}]   ;;  %s2492_s3 = inlined_call_operand.vmem [shape: f32[64,128], index: 3, kind: input, shape index: {}]   ;;  %s2493_s4 = inlined_call_operand.vmem [shape: s8[128,128], index: 4, kind: input, shape index: {}]   ;;  %s2494_s5 = inlined_call_operand.vmem [shape: f32[1,128], index: 5, kind: input, shape index: {}]   ;;  %s2495_s6 = inlined_call_operand.vmem [shape: f32[4,64,128], index: 6, kind: output, shape index: {}]  }
   0x1   :  { %s18_s23 = sshll.u32 %s2489_s0, 4  ;;  %s19_s23 = int_to_ptr.vmem [resolvable:$true] %s18_s23 }
   0x2   :  { %s1235_s24 = scalar_lea.vmem %s19_s23, 64  ;;  %p1240_p1 = scmp.lt.s32.totalorder %s19_s23, %s19_s23 }
   0x3   :  { %p1236_p0 = scmp.ne.s32.totalorder %s19_s23, %s1235_s24  ;;  %p1241_p2 = scmp.lt.s32.totalorder %s1235_s24, %s1235_s24 }
   0x5   :  { %p1242_p3 = por %p1241_p2, %p1240_p1 }
   0x7   :  { %p1243_p4 = pnand %p1242_p3, %p1236_p0 }
   0x9   :  { %1246 = shalt.err (!%p1243_p4)
}
   0xa   :  { %s1249_s25 = smov [#allocation2]  }
   0xb   :  { %21 = dma.vmem_to_smem %s19_s23, 64, %s1249_s25, [#allocation3]  }
   0xc   :  { %1247 = dma.done.wait [#allocation3], 64  }
   0xd   :  { %1248 = vsyncadd [#allocation3], 4294967232 }
   0xe   :  { %35 = sfence }
   0xf   :  { %v1291_v0 = vld [vmem:[%s2490_s1 + $0x10] sm:$0xff]  ;;  %v1296_v1 = vld [vmem:[%s2490_s1] sm:$0xff]  ;;  %v1305_v3 = vld [vmem:[%s2490_s1 + $0x8] sm:$0xff]  ;;  %s1102_s27 = sld [smem:[#allocation2 + $0x80]]  ;;  %s1100_s29 = sld [smem:[#allocation2 + $0x2]] }
  0x10   :  { %73 = vadd.xlane.f32.xlu1 %v1291_v0  ;;  %69 = vadd.xlane.f32.xlu0 %v1296_v1  ;;  %v185_v2 = vmul.f32 %v1296_v1, %v1296_v1  ;;  %v186_v4 = vmul.f32 %v1305_v3, %v1305_v3  ;;  %v1313_v5 = vld [vmem:[%s2490_s1 + $0x18] sm:$0xff]  ;;  %v1319_v6 = vld [vmem:[%s2490_s1 + $0x80] sm:$0xff]  ;;  %v1324_v7 = vld [vmem:[%s2490_s1 + $0x88] sm:$0xff]  ;;  %v187_v8 = vmul.f32 %v1291_v0, %v1291_v0  ;;  %s1114_s28 = sld [smem:[#allocation2 + $0x100]]  ;;  %s1104_s30 = sld [smem:[#allocation2 + $0x82]] }
  0x11   :  { %v1333_v9 = vld [vmem:[%s2490_s1 + $0x20] sm:$0xff]  ;;  %v188_v10 = vmul.f32 %v1313_v5, %v1313_v5  ;;  %v1341_v11 = vld [vmem:[%s2490_s1 + $0x90] sm:$0xff]  ;;  %v201_v12 = vmul.f32 %v1319_v6, %v1319_v6  ;;  %v202_v13 = vmul.f32 %v1324_v7, %v1324_v7  ;;  %v1351_v14 = vld [vmem:[%s2490_s1 + $0x28] sm:$0xff]  ;;  %s1126_s0 = sld [smem:[#allocation2 + $0x180]]  ;;  %s1116_s7 = sld [smem:[#allocation2 + $0x102]] }
  0x12   :  { %v1356_v15 = vld [vmem:[%s2490_s1 + $0x98] sm:$0xff]  ;;  %v189_v16 = vmul.f32 %v1333_v9, %v1333_v9  ;;  %v203_v17 = vmul.f32 %v1341_v11, %v1341_v11  ;;  %v1367_v18 = vld [vmem:[%s2490_s1 + $0x30] sm:$0xff]  ;;  %v1372_v19 = vld [vmem:[%s2490_s1 + $0xa0] sm:$0xff]  ;;  %v190_v20 = vmul.f32 %v1351_v14, %v1351_v14  ;;  %s1128_s8 = sld [smem:[#allocation2 + $0x182]]  ;;  %s1099_s9 = sld [smem:[#allocation2 + $0x1]] }
  0x13   :  { %v204_v21 = vmul.f32 %v1356_v15, %v1356_v15  ;;  %v1383_v22 = vld [vmem:[%s2490_s1 + $0x38] sm:$0xff]  ;;  %v1388_v23 = vld [vmem:[%s2490_s1 + $0xa8] sm:$0xff]  ;;  %v191_v24 = vmul.f32 %v1367_v18, %v1367_v18  ;;  %v205_v25 = vmul.f32 %v1372_v19, %v1372_v19  ;;  %v1401_v27 = vld [vmem:[%s2490_s1 + $0xb0] sm:$0xff]  ;;  %s1103_s10 = sld [smem:[#allocation2 + $0x81]]  ;;  %s1101_s13 = sld [smem:[#allocation2 + $0x3]] }
  0x14   :  { %71 = vadd.xlane.f32.xlu0 %v1305_v3  ;;  %217 = vadd.xlane.f32.xlu1 %v185_v2  ;;  %v192_v26 = vmul.f32 %v1383_v22, %v1383_v22  ;;  %v206_v28 = vmul.f32 %v1388_v23, %v1388_v23  ;;  %v1409_v29 = vld [vmem:[%s2490_s1 + $0x40] sm:$0xff]  ;;  %v1415_v30 = vld [vmem:[%s2490_s1 + $0x48] sm:$0xff]  ;;  %v1420_v31 = vld [vmem:[%s2490_s1 + $0xb8] sm:$0xff]  ;;  %v207_v32 = vmul.f32 %v1401_v27, %v1401_v27  ;;  %s1115_s11 = sld [smem:[#allocation2 + $0x101]]  ;;  %s1105_s14 = sld [smem:[#allocation2 + $0x83]] }
  0x15   :  { %v1429_v33 = vld [vmem:[%s2490_s1 + $0x50] sm:$0xff]  ;;  %v193_v34 = vmul.f32 %v1409_v29, %v1409_v29  ;;  %v194_v35 = vmul.f32 %v1415_v30, %v1415_v30  ;;  %v208_v36 = vmul.f32 %v1420_v31, %v1420_v31  ;;  %v1441_v37 = vld [vmem:[%s2490_s1 + $0x58] sm:$0xff]  ;;  %v1447_v38 = vld [vmem:[%s2490_s1 + $0xc0] sm:$0xff]  ;;  %s1127_s12 = sld [smem:[#allocation2 + $0x181]]  ;;  %s1129_s15 = sld [smem:[#allocation2 + $0x183]] }
  0x16   :  { %2505 = vst [vmem:[#allocation5_spill] sm:$0xff] %v1447_v38  ;;  %v1452_v39 = vld [vmem:[%s2490_s1 + $0xc8] sm:$0xff]  ;;  %v505_v40 = vld [vmem:[%s2493_s4] sm:$0xff]  ;;  %v195_v42 = vmul.f32 %v1429_v33, %v1429_v33  ;;  %v196_v45 = vmul.f32 %v1441_v37, %v1441_v37  ;;  %v1472_v46 = vld [vmem:[%s2490_s1 + $0xd0] sm:$0xff]  ;;  %v209_v49 = vmul.f32 %v1447_v38, %v1447_v38 }
  0x17   :  { %2506 = vst [vmem:[#allocation6_spill] sm:$0xff] %v1452_v39  ;;  %v509_v41 = vunpack.c.l.s8.bf16 %v505_v40  ;;  %v1464_v43 = vld [vmem:[%s2490_s1 + $0x60] sm:$0xff]  ;;  %v510_v44 = vunpack.c.h.s8.bf16 %v505_v40  ;;  %2507 = vst [vmem:[#allocation7_spill] sm:$0xff] %v1472_v46  ;;  %v506_v47 = vld [vmem:[%s2493_s4 + $0x8] sm:$0xff]  ;;  %v210_v50 = vmul.f32 %v1452_v39, %v1452_v39  ;;  %v211_v57 = vmul.f32 %v1472_v46, %v1472_v46 }
  0x18   :  { %219 = vadd.xlane.f32.xlu0 %v186_v4  ;;  %75 = vadd.xlane.f32.xlu1 %v1313_v5  ;;  %v511_v48 = vunpack.c.l.s8.bf16 %v506_v47  ;;  %v512_v51 = vunpack.c.h.s8.bf16 %v506_v47  ;;  %v1485_v52 = vld [vmem:[%s2490_s1 + $0x68] sm:$0xff]  ;;  %v1490_v53 = vld [vmem:[%s2490_s1 + $0xd8] sm:$0xff]  ;;  %v507_v54 = vld [vmem:[%s2493_s4 + $0x10] sm:$0xff]  ;;  %v197_v56 = vmul.f32 %v1464_v43, %v1464_v43 }
  0x19   :  { %1162 = vmatprep.subr.bf16.mxu0 %v509_v41  ;;  %1210 = vmatprep.subr.bf16.mxu1 %v509_v41  ;;  %2508 = vst [vmem:[#allocation8_spill] sm:$0xff] %v1490_v53  ;;  %v513_v55 = vunpack.c.l.s8.bf16 %v507_v54  ;;  %v514_v58 = vunpack.c.h.s8.bf16 %v507_v54  ;;  %v1504_v59 = vld [vmem:[%s2490_s1 + $0x70] sm:$0xff]  ;;  %v1509_v60 = vld [vmem:[%s2490_s1 + $0xe0] sm:$0xff]  ;;  %v508_v61 = vld [vmem:[%s2493_s4 + $0x18] sm:$0xff]  ;;  %v198_v63 = vmul.f32 %v1485_v52, %v1485_v52  ;;  %v212_v2 = vmul.f32 %v1490_v53, %v1490_v53  ;;  %s1117_s4 = sld [smem:[#allocation2 + $0x103]] }
  0x1a   :  { %1163 = vmatpush3.bf16.msra.mxu0 %v509_v41  ;;  %1218 = vmatpush3.bf16.msra.mxu1 %v509_v41  ;;  %2509 = vst [vmem:[#allocation9_spill] sm:$0xff] %v1509_v60  ;;  %v515_v62 = vunpack.c.l.s8.bf16 %v508_v61  ;;  %v516_v4 = vunpack.c.h.s8.bf16 %v508_v61 }
  0x1b   :  { %1164 = vmatprep.subr.bf16.mxu0 %v510_v44  ;;  %1211 = vmatprep.subr.bf16.mxu1 %v510_v44 }
  0x1c   :  { %101 = vadd.xlane.f32.xlu0 %v1319_v6  ;;  %103 = vadd.xlane.f32.xlu1 %v1324_v7 }
  0x1e   :  { %1165 = vmatpush3.bf16.msra.mxu0 %v510_v44  ;;  %1219 = vmatpush3.bf16.msra.mxu1 %v510_v44 }
  0x1f   :  { %1166 = vmatprep.subr.bf16.mxu0 %v511_v48  ;;  %1212 = vmatprep.subr.bf16.mxu1 %v511_v48 }
  0x20   :  { %221 = vadd.xlane.f32.xlu0 %v187_v8  ;;  %77 = vadd.xlane.f32.xlu1 %v1333_v9  ;;  %v1523_v8 = vld [vmem:[%s2490_s1 + $0x78] sm:$0xff] }
  0x21   :  { %2510 = vst [vmem:[#allocation10_spill] sm:$0xff] %v1523_v8 }
  0x22   :  { %1167 = vmatpush3.bf16.msra.mxu0 %v511_v48  ;;  %1220 = vmatpush3.bf16.msra.mxu1 %v511_v48 }
  0x23   :  { %1168 = vmatprep.subr.bf16.mxu0 %v512_v51  ;;  %1213 = vmatprep.subr.bf16.mxu1 %v512_v51 }
  0x24   :  { %105 = vadd.xlane.f32.xlu0 %v1341_v11  ;;  %223 = vadd.xlane.f32.xlu1 %v188_v10  ;;  %v1528_v10 = vld [vmem:[%s2490_s1 + $0xe8] sm:$0xff] }
  0x25   :  { %2511 = vst [vmem:[#allocation11_spill] sm:$0xff] %v1528_v10 }
  0x26   :  { %1169 = vmatpush3.bf16.msra.mxu0 %v512_v51  ;;  %1221 = vmatpush3.bf16.msra.mxu1 %v512_v51 }
  0x27   :  { %1170 = vmatprep.subr.bf16.mxu0 %v513_v55  ;;  %1214 = vmatprep.subr.bf16.mxu1 %v513_v55 }
  0x28   :  { %249 = vadd.xlane.f32.xlu0 %v201_v12  ;;  %251 = vadd.xlane.f32.xlu1 %v202_v13  ;;  %v199_v12 = vmul.f32 %v1504_v59, %v1504_v59  ;;  %v213_v13 = vmul.f32 %v1509_v60, %v1509_v60 }
  0x2a   :  { %1171 = vmatpush3.bf16.msra.mxu0 %v513_v55  ;;  %1222 = vmatpush3.bf16.msra.mxu1 %v513_v55 }
  0x2b   :  { %1172 = vmatprep.subr.bf16.mxu0 %v514_v58  ;;  %1215 = vmatprep.subr.bf16.mxu1 %v514_v58 }
  0x2c   :  { %79 = vadd.xlane.f32.xlu0 %v1351_v14  ;;  %107 = vadd.xlane.f32.xlu1 %v1356_v15 }
  0x2e   :  { %1173 = vmatpush3.bf16.msra.mxu0 %v514_v58  ;;  %1223 = vmatpush3.bf16.msra.mxu1 %v514_v58 }
  0x2f   :  { %1174 = vmatprep.subr.bf16.mxu0 %v515_v62  ;;  %1216 = vmatprep.subr.bf16.mxu1 %v515_v62 }
  0x30   :  { %225 = vadd.xlane.f32.xlu0 %v189_v16  ;;  %253 = vadd.xlane.f32.xlu1 %v203_v17  ;;  %v200_v16 = vmul.f32 %v1523_v8, %v1523_v8  ;;  %v1541_v17 = vld [vmem:[%s2490_s1 + $0xf0] sm:$0xff] }
  0x31   :  { %2512 = vst [vmem:[#allocation12_spill] sm:$0xff] %v1541_v17 }
  0x32   :  { %1175 = vmatpush3.bf16.msra.mxu0 %v515_v62  ;;  %1224 = vmatpush3.bf16.msra.mxu1 %v515_v62 }
  0x33   :  { %1176 = vmatprep.subr.bf16.mxu0 %v516_v4  ;;  %1217 = vmatprep.subr.bf16.mxu1 %v516_v4 }
  0x34   :  { %81 = vadd.xlane.f32.xlu0 %v1367_v18  ;;  %109 = vadd.xlane.f32.xlu1 %v1372_v19 }
  0x36   :  { %1177 = vmatpush3.bf16.msra.mxu0 %v516_v4  ;;  %1225 = vmatpush3.bf16.msra.mxu1 %v516_v4 }
  0x38   :  { %227 = vadd.xlane.f32.xlu0 %v190_v20  ;;  %255 = vadd.xlane.f32.xlu1 %v204_v21  ;;  %v214_v20 = vmul.f32 %v1528_v10, %v1528_v10  ;;  %v1549_v21 = vld [vmem:[%s2490_s1 + $0xf8] sm:$0xff] }
  0x39   :  { %2513 = vst [vmem:[#allocation13_spill] sm:$0xff] %v1549_v21 }
  0x3c   :  { %83 = vadd.xlane.f32.xlu0 %v1383_v22  ;;  %111 = vadd.xlane.f32.xlu1 %v1388_v23 }
  0x40   :  { %229 = vadd.xlane.f32.xlu0 %v191_v24  ;;  %257 = vadd.xlane.f32.xlu1 %v205_v25  ;;  %v215_v24 = vmul.f32 %v1541_v17, %v1541_v17  ;;  %v216_v25 = vmul.f32 %v1549_v21, %v1549_v21 }
  0x44   :  { %113 = vadd.xlane.f32.xlu0 %v1401_v27  ;;  %231 = vadd.xlane.f32.xlu1 %v192_v26 }
  0x48   :  { %259 = vadd.xlane.f32.xlu0 %v206_v28  ;;  %85 = vadd.xlane.f32.xlu1 %v1409_v29 }
  0x4c   :  { %87 = vadd.xlane.f32.xlu0 %v1415_v30  ;;  %115 = vadd.xlane.f32.xlu1 %v1420_v31 }
  0x50   :  { %261 = vadd.xlane.f32.xlu0 %v207_v32  ;;  %89 = vadd.xlane.f32.xlu1 %v1429_v33 }
  0x54   :  { %233 = vadd.xlane.f32.xlu0 %v193_v34  ;;  %235 = vadd.xlane.f32.xlu1 %v194_v35 }
  0x58   :  { %263 = vadd.xlane.f32.xlu0 %v208_v36  ;;  %91 = vadd.xlane.f32.xlu1 %v1441_v37 }
  0x5c   :  { %117 = vadd.xlane.f32.xlu0 %v1447_v38  ;;  %119 = vadd.xlane.f32.xlu1 %v1452_v39  ;;  %v1681_v39 = vld [vmem:[%s2491_s2 + $0x30] sm:$0xff] }
  0x60   :  { %237 = vadd.xlane.f32.xlu0 %v195_v42  ;;  %93 = vadd.xlane.f32.xlu1 %v1464_v43 }
  0x64   :  { %121 = vadd.xlane.f32.xlu0 %v1472_v46  ;;  %239 = vadd.xlane.f32.xlu1 %v196_v45 }
  0x68   :  { %265 = vadd.xlane.f32.xlu0 %v209_v49  ;;  %267 = vadd.xlane.f32.xlu1 %v210_v50 }
  0x6c   :  { %95 = vadd.xlane.f32.xlu0 %v1485_v52  ;;  %123 = vadd.xlane.f32.xlu1 %v1490_v53 }
  0x70   :  { %241 = vadd.xlane.f32.xlu0 %v197_v56  ;;  %269 = vadd.xlane.f32.xlu1 %v211_v57 }
  0x74   :  { %97 = vadd.xlane.f32.xlu0 %v1504_v59  ;;  %125 = vadd.xlane.f32.xlu1 %v1509_v60 }
  0x78   :  { %243 = vadd.xlane.f32.xlu0 %v198_v63  ;;  %271 = vadd.xlane.f32.xlu1 %v212_v2 }
  0x7c   :  { %99 = vadd.xlane.f32.xlu0 %v1523_v8  ;;  %127 = vadd.xlane.f32.xlu1 %v1528_v10 }
  0x80   :  { %245 = vadd.xlane.f32.xlu0 %v199_v12  ;;  %273 = vadd.xlane.f32.xlu1 %v213_v13 }
  0x84   :  { %129 = vadd.xlane.f32.xlu0 %v1541_v17  ;;  %247 = vadd.xlane.f32.xlu1 %v200_v16 }
  0x88   :  { %275 = vadd.xlane.f32.xlu0 %v214_v20  ;;  %131 = vadd.xlane.f32.xlu1 %v1549_v21 }
  0x8c   :  { %277 = vadd.xlane.f32.xlu0 %v215_v24  ;;  %279 = vadd.xlane.f32.xlu1 %v216_v25 }
  0x9d   :  { %v74_v26 = vpop.xlane.xlu1 %73  ;;  %v70_v28 = vpop.xlane.xlu0 %69 }
  0xa1   :  { %v72_v32 = vpop.xlane.xlu0 %71  ;;  %v218_v34 = vpop.xlane.xlu1 %217 }
  0xa2   :  { %v133_v54 = vadd.f32 %v72_v32, %v70_v28 }
  0xa4   :  { %v134_v57 = vadd.f32 %v133_v54, %v74_v26 }
  0xa5   :  { %v220_v35 = vpop.xlane.xlu0 %219  ;;  %v76_v36 = vpop.xlane.xlu1 %75 }
  0xa6   :  { %v135_v62 = vadd.f32 %v134_v57, %v76_v36  ;;  %v281_v12 = vadd.f32 %v220_v35, %v218_v34 }
  0xa9   :  { %v102_v40 = vpop.xlane.xlu0 %101  ;;  %v104_v41 = vpop.xlane.xlu1 %103 }
  0xaa   :  { %v159_v53 = vadd.f32 %v104_v41, %v102_v40 }
  0xad   :  { %v222_v42 = vpop.xlane.xlu0 %221  ;;  %v78_v44 = vpop.xlane.xlu1 %77 }
  0xae   :  { %v136_v63 = vadd.f32 %v135_v62, %v78_v44  ;;  %v282_v16 = vadd.f32 %v281_v12, %v222_v42 }
  0xb1   :  { %v106_v45 = vpop.xlane.xlu0 %105  ;;  %v224_v47 = vpop.xlane.xlu1 %223 }
  0xb2   :  { %v283_v21 = vadd.f32 %v282_v16, %v224_v47  ;;  %v160_v46 = vadd.f32 %v159_v53, %v106_v45 }
  0xb5   :  { %v250_v48 = vpop.xlane.xlu0 %249  ;;  %v252_v49 = vpop.xlane.xlu1 %251 }
  0xb9   :  { %v80_v50 = vpop.xlane.xlu0 %79  ;;  %v108_v51 = vpop.xlane.xlu1 %107 }
  0xba   :  { %v137_v13 = vadd.f32 %v136_v63, %v80_v50  ;;  %v161_v34 = vadd.f32 %v160_v46, %v108_v51 }
  0xbd   :  { %v226_v55 = vpop.xlane.xlu0 %225  ;;  %v254_v56 = vpop.xlane.xlu1 %253 }
  0xbe   :  { %v284_v10 = vadd.f32 %v283_v21, %v226_v55 }
  0xc1   :  { %v82_v58 = vpop.xlane.xlu0 %81  ;;  %v110_v61 = vpop.xlane.xlu1 %109 }
  0xc2   :  { %v138_v20 = vadd.f32 %v137_v13, %v82_v58  ;;  %v162_v50 = vadd.f32 %v161_v34, %v110_v61 }
  0xc5   :  { %v228_v2 = vpop.xlane.xlu0 %227  ;;  %v256_v4 = vpop.xlane.xlu1 %255 }
  0xc6   :  { %v285_v26 = vadd.f32 %v284_v10, %v228_v2 }
  0xc9   :  { %v84_v24 = vpop.xlane.xlu0 %83  ;;  %v112_v25 = vpop.xlane.xlu1 %111 }
  0xca   :  { %v139_v17 = vadd.f32 %v138_v20, %v84_v24  ;;  %v163_v21 = vadd.f32 %v162_v50, %v112_v25 }
  0xcc   :  { %v140_v60 = vrot.slane %v139_v17, 4 }
  0xcd   :  { %v230_v28 = vpop.xlane.xlu0 %229  ;;  %v258_v32 = vpop.xlane.xlu1 %257 }
  0xce   :  { %v141_v54 = vadd.f32 %v140_v60, %v139_v17  ;;  %v286_v44 = vadd.f32 %v285_v26, %v230_v28  ;;  %v307_v17 = vadd.f32 %v252_v49, %v250_v48 }
  0xd0   :  { %v142_v36 = vrot.slane %v141_v54, 2  ;;  %v308_v46 = vadd.f32 %v307_v17, %v254_v56 }
  0xd1   :  { %v114_v57 = vpop.xlane.xlu0 %113  ;;  %v232_v62 = vpop.xlane.xlu1 %231 }
  0xd2   :  { %v143_v35 = vadd.f32 %v142_v36, %v141_v54  ;;  %v287_v42 = vadd.f32 %v286_v44, %v232_v62  ;;  %v164_v40 = vadd.f32 %v163_v21, %v114_v57  ;;  %v309_v24 = vadd.f32 %v308_v46, %v256_v4 }
  0xd4   :  { %v144_v58 = vrot.slane %v143_v35, 1  ;;  %v288_v63 = vrot.slane %v287_v42, 4  ;;  %v310_v26 = vadd.f32 %v309_v24, %v258_v32  ;;  %v1593_v24 = vld [vmem:[%s2491_s2] sm:$0xff] }
  0xd5   :  { %v260_v47 = vpop.xlane.xlu0 %259  ;;  %v1556_v12 = vpop.xlane.xlu1 %85 }
  0xd6   :  { %v289_v55 = vadd.f32 %v288_v63, %v287_v42  ;;  %v145_v13 = vadd.f32 %v144_v58, %v143_v35  ;;  %v311_v57 = vadd.f32 %v310_v26, %v260_v47 }
  0xd8   :  { %v290_v10 = vrot.slane %v289_v55, 2  ;;  %v1560_v51 = vmul.f32 0.00015943877, %v145_v13 }
  0xd9   :  { %v1558_v60 = vpop.xlane.xlu0 %87  ;;  %v116_v53 = vpop.xlane.xlu1 %115 }
  0xda   :  { %v291_v41 = vadd.f32 %v290_v10, %v289_v55  ;;  %v165_v45 = vadd.f32 %v164_v40, %v116_v53  ;;  %v341_v54 = vmul.f32 %v1560_v51, %v1560_v51  ;;  %v361_v46 = vsub.f32 %v1296_v1, %v1560_v51 }
  0xdb   :  { %v365_v1 = vsub.f32 %v1333_v9, %v1560_v51  ;;  %v367_v9 = vsub.f32 %v1367_v18, %v1560_v51 }
  0xdc   :  { %v292_v61 = vrot.slane %v291_v41, 1  ;;  %v166_v2 = vrot.slane %v165_v45, 4 }
  0xdd   :  { %v262_v16 = vpop.xlane.xlu0 %261  ;;  %v1562_v20 = vpop.xlane.xlu1 %89 }
  0xde   :  { %v293_v25 = vadd.f32 %v292_v61, %v291_v41  ;;  %v167_v28 = vadd.f32 %v166_v2, %v165_v45  ;;  %v312_v35 = vadd.f32 %v311_v57, %v262_v16  ;;  %v362_v16 = vsub.f32 %v1305_v3, %v1560_v51  ;;  %v1604_v3 = vld [vmem:[%s2491_s2 + $0x8] sm:$0xff] }
  0xe0   :  { %v337_v36 = vmul.f32 0.00015943877, %v293_v25  ;;  %v168_v44 = vrot.slane %v167_v28, 2  ;;  %v363_v25 = vsub.f32 %v1291_v0, %v1560_v51  ;;  %v1614_v0 = vld [vmem:[%s2491_s2 + $0x18] sm:$0xff] }
  0xe1   :  { %v1566_v48 = vpop.xlane.xlu0 %233  ;;  %v1568_v49 = vpop.xlane.xlu1 %235 }
  0xe2   :  { %v345_v56 = vsub.f32 %v337_v36, %v341_v54  ;;  %v169_v34 = vadd.f32 %v168_v44, %v167_v28  ;;  %v364_v28 = vsub.f32 %v1313_v5, %v1560_v51  ;;  %v1609_v36 = vld [vmem:[%s2491_s2 + $0x10] sm:$0xff]  ;;  %v366_v5 = vsub.f32 %v1351_v14, %v1560_v51  ;;  %v1635_v14 = vld [vmem:[%s2491_s2 + $0x28] sm:$0xff] }
  0xe3   :  { %v368_v44 = vsub.f32 %v1383_v22, %v1560_v51  ;;  %v1642_v51 = vld [vmem:[%s2492_s3 + $0x8] sm:$0xff] }
  0xe4   :  { %v349_v62 = vmax.f32 %v345_v56, 0.0  ;;  %v170_v32 = vrot.slane %v169_v34, 1 }
  0xe5   :  { %v264_v42 = vpop.xlane.xlu0 %263  ;;  %v1570_v50 = vpop.xlane.xlu1 %91 }
  0xe6   :  { %v353_v4 = vadd.f32 1e-05, %v349_v62  ;;  %v313_v58 = vadd.f32 %v312_v35, %v264_v42  ;;  %v171_v40 = vadd.f32 %v170_v32, %v169_v34  ;;  %v1625_v62 = vld [vmem:[%s2492_s3] sm:$0xff] }
  0xe7   :  { %v1630_v42 = vld [vmem:[%s2491_s2 + $0x20] sm:$0xff] }
  0xe8   :  { %1227 = vrsqrt.f32 %v353_v4  ;;  %v314_v63 = vrot.slane %v313_v58, 4  ;;  %v1580_v41 = vmul.f32 0.00015943877, %v171_v40  ;;  %v1647_v4 = vld [vmem:[%s2492_s3 + $0x10] sm:$0xff] }
  0xe9   :  { %v1572_v21 = vpop.xlane.xlu0 %117  ;;  %v1574_v55 = vpop.xlane.xlu1 %119 }
  0xea   :  { %v315_v13 = vadd.f32 %v314_v63, %v313_v58  ;;  %v343_v22 = vmul.f32 %v1580_v41, %v1580_v41  ;;  %v1652_v58 = vld [vmem:[%s2492_s3 + $0x18] sm:$0xff] }
  0xec   :  { %v316_v10 = vrot.slane %v315_v13, 2 }
  0xed   :  { %v1576_v53 = vpop.xlane.xlu0 %237  ;;  %v1578_v47 = vpop.xlane.xlu1 %93 }
  0xee   :  { %v317_v17 = vadd.f32 %v316_v10, %v315_v13 }
  0xf0   :  { %v318_v45 = vrot.slane %v317_v17, 1 }
  0xf1   :  { %v1584_v61 = vpop.xlane.xlu0 %121  ;;  %v1586_v2 = vpop.xlane.xlu1 %239 }
  0xf2   :  { %v1228_v26 = vpop.eup %1227  ;;  %v319_v54 = vadd.f32 %v318_v45, %v317_v17 }
  0xf3   :  { %v393_v56 = vmul.f32 %v1228_v26, %v361_v46  ;;  %v394_v57 = vmul.f32 %v1228_v26, %v362_v16  ;;  %v395_v34 = vmul.f32 %v1228_v26, %v363_v25  ;;  %v396_v35 = vmul.f32 %v1228_v26, %v364_v28  ;;  %v1665_v16 = vld [vmem:[%s2492_s3 + $0x20] sm:$0xff]  ;;  %v1670_v25 = vld [vmem:[%s2492_s3 + $0x28] sm:$0xff] }
  0xf4   :  { %v339_v18 = vmul.f32 0.00015943877, %v319_v54  ;;  %v397_v32 = vmul.f32 %v1228_v26, %v365_v1  ;;  %v398_v63 = vmul.f32 %v1228_v26, %v366_v5  ;;  %v399_v5 = vmul.f32 %v1228_v26, %v367_v9  ;;  %v1688_v9 = vld [vmem:[%s2491_s2 + $0x38] sm:$0xff] }
  0xf5   :  { %v1654_v13 = vpop.xlane.xlu0 %265  ;;  %v1656_v40 = vpop.xlane.xlu1 %267  ;;  %v433_v10 = vmul.f32 %v1593_v24, %v393_v56  ;;  %v434_v17 = vmul.f32 %v1604_v3, %v394_v57  ;;  %v435_v45 = vmul.f32 %v1609_v36, %v395_v34  ;;  %v436_v46 = vmul.f32 %v1614_v0, %v396_v35 }
  0xf6   :  { %v347_v28 = vsub.f32 %v339_v18, %v343_v22  ;;  %v437_v1 = vmul.f32 %v1630_v42, %v397_v32  ;;  %v438_v54 = vmul.f32 %v1635_v14, %v398_v63  ;;  %v400_v32 = vmul.f32 %v1228_v26, %v368_v44  ;;  %v1697_v26 = vld [vmem:[%s2492_s3 + $0x30] sm:$0xff]  ;;  %v1702_v44 = vld [vmem:[%s2492_s3 + $0x38] sm:$0xff]  ;;  %s769_s3 = sld [smem:[#allocation2]] }
  0xf7   :  { %v473_v56 = vadd.f32 %v1625_v62, %v433_v10  ;;  %v474_v57 = vadd.f32 %v1642_v51, %v434_v17  ;;  %v475_v34 = vadd.f32 %v1647_v4, %v435_v45  ;;  %v476_v35 = vadd.f32 %v1652_v58, %v436_v46 }
  0xf8   :  { %v351_v38 = vmax.f32 %v347_v28, 0.0  ;;  %v477_v18 = vadd.f32 %v1665_v16, %v437_v1  ;;  %v478_v22 = vadd.f32 %v1670_v25, %v438_v54  ;;  %v439_v8 = vmul.f32 %v1681_v39, %v399_v5 }
  0xf9   :  { %v96_v63 = vpop.xlane.xlu0 %95  ;;  %v1690_v10 = vpop.xlane.xlu1 %123  ;;  %v517_v17 = vpack.c.bf16 %v474_v57, %v473_v56  ;;  %v518_v45 = vpack.c.bf16 %v476_v35, %v475_v34  ;;  %v440_v1 = vmul.f32 %v1688_v9, %v400_v32  ;;  %v146_v5 = vadd.f32 %v1558_v60, %v1556_v12 }
  0xfa   :  { %v355_v46 = vadd.f32 1e-05, %v351_v38  ;;  %v519_v28 = vpack.c.bf16 %v478_v22, %v477_v18  ;;  %v479_v56 = vadd.f32 %v1697_v26, %v439_v8  ;;  %v294_v22 = vadd.f32 %v1568_v49, %v1566_v48 }
  0xfb   :  { %1178 = vmatprep.mubr.bf16.mxu0 %v517_v17  ;;  %v480_v57 = vadd.f32 %v1702_v44, %v440_v1  ;;  %v147_v34 = vadd.f32 %v146_v5, %v1562_v20  ;;  %v377_v12 = vsub.f32 %v1319_v6, %v1580_v41  ;;  %v378_v20 = vsub.f32 %v1324_v7, %v1580_v41 }
  0xfc   :  { %1229 = vrsqrt.f32 %v355_v46  ;;  %1179 = vmatmul.mubr.bf16.vlgmr.msra.gmra.mrb[0].mxu0 %v518_v45  ;;  %v172_v45 = vadd.f32 %v1574_v55, %v1572_v21  ;;  %v295_v8 = vadd.f32 %v294_v22, %v1576_v53  ;;  %v379_v48 = vsub.f32 %v1341_v11, %v1580_v41 }
  0xfd   :  { %v242_v54 = vpop.xlane.xlu0 %241  ;;  %1182 = vmatprep.mubr.bf16.mxu0 %v519_v28  ;;  %v1704_v38 = vpop.xlane.xlu1 %269  ;;  %v148_v32 = vadd.f32 %v147_v34, %v1570_v50  ;;  %v520_v17 = vpack.c.bf16 %v480_v57, %v479_v56  ;;  %v380_v46 = vsub.f32 %v1356_v15, %v1580_v41  ;;  %v381_v21 = vsub.f32 %v1372_v19, %v1580_v41 }
  0xfe   :  { %v382_v6 = vsub.f32 %v1388_v23, %v1580_v41  ;;  %v383_v55 = vsub.f32 %v1401_v27, %v1580_v41  ;;  %v173_v7 = vadd.f32 %v172_v45, %v1584_v61  ;;  %v384_v28 = vsub.f32 %v1420_v31, %v1580_v41 }
  0xff   :  { %v149_v60 = vadd.f32 %v148_v32, %v1578_v47  ;;  %v296_v47 = vadd.f32 %v295_v8, %v1586_v2 }
 0x101   :  { %v98_v35 = vpop.xlane.xlu0 %97  ;;  %v126_v18 = vpop.xlane.xlu1 %125  ;;  %v150_v11 = vadd.f32 %v149_v60, %v96_v63 }
 0x103   :  { %v151_v19 = vadd.f32 %v150_v11, %v98_v35 }
 0x104   :  { %1183 = vmatmul.mubr.bf16.gmra.mrb[4].mxu0 %v520_v17 }
 0x105   :  { %v244_v49 = vpop.xlane.xlu0 %243  ;;  %v272_v50 = vpop.xlane.xlu1 %271 }
 0x106   :  { %v1230_v53 = vpop.eup %1229 }
 0x107   :  { %v409_v1 = vmul.f32 %v1230_v53, %v377_v12  ;;  %v410_v15 = vmul.f32 %v1230_v53, %v378_v20  ;;  %v411_v5 = vmul.f32 %v1230_v53, %v379_v48  ;;  %v412_v56 = vmul.f32 %v1230_v53, %v380_v46 }
 0x108   :  { %v413_v57 = vmul.f32 %v1230_v53, %v381_v21  ;;  %v414_v34 = vmul.f32 %v1230_v53, %v382_v6  ;;  %v415_v23 = vmul.f32 %v1230_v53, %v383_v55  ;;  %v416_v45 = vmul.f32 %v1230_v53, %v384_v28 }
 0x109   :  { %v100_v22 = vpop.xlane.xlu0 %99  ;;  %v128_v32 = vpop.xlane.xlu1 %127  ;;  %v449_v27 = vmul.f32 %v1593_v24, %v409_v1  ;;  %v450_v61 = vmul.f32 %v1604_v3, %v410_v15  ;;  %v451_v2 = vmul.f32 %v1609_v36, %v411_v5  ;;  %v452_v63 = vmul.f32 %v1614_v0, %v412_v56 }
 0x10a   :  { %v152_v17 = vadd.f32 %v151_v19, %v100_v22  ;;  %v453_v31 = vmul.f32 %v1630_v42, %v413_v57  ;;  %v454_v41 = vmul.f32 %v1635_v14, %v414_v34  ;;  %v297_v20 = vadd.f32 %v296_v47, %v242_v54 }
 0x10b   :  { %v489_v35 = vadd.f32 %v1625_v62, %v449_v27  ;;  %v490_v12 = vadd.f32 %v1642_v51, %v450_v61  ;;  %v491_v8 = vadd.f32 %v1647_v4, %v451_v2  ;;  %v492_v60 = vadd.f32 %v1652_v58, %v452_v63 }
 0x10c   :  { %v153_v48 = vrot.slane %v152_v17, 4  ;;  %v493_v46 = vadd.f32 %v1665_v16, %v453_v31  ;;  %v494_v21 = vadd.f32 %v1670_v25, %v454_v41  ;;  %v174_v6 = vadd.f32 %v173_v7, %v1690_v10 }
 0x10d   :  { %v246_v55 = vpop.xlane.xlu0 %245  ;;  %v274_v11 = vpop.xlane.xlu1 %273  ;;  %v525_v1 = vpack.c.bf16 %v490_v12, %v489_v35  ;;  %v526_v53 = vpack.c.bf16 %v492_v60, %v491_v8  ;;  %v298_v28 = vadd.f32 %v297_v20, %v244_v49  ;;  %v455_v5 = vmul.f32 %v1681_v39, %v415_v23 }
 0x10e   :  { %v154_v15 = vadd.f32 %v153_v48, %v152_v17  ;;  %v456_v56 = vmul.f32 %v1688_v9, %v416_v45  ;;  %v320_v54 = vadd.f32 %v1656_v40, %v1654_v13  ;;  %v175_v47 = vadd.f32 %v174_v6, %v126_v18 }
 0x10f   :  { %1194 = vmatprep.mubr.bf16.mxu1 %v525_v1  ;;  %v527_v19 = vpack.c.bf16 %v494_v21, %v493_v46  ;;  %v299_v34 = vadd.f32 %v298_v28, %v246_v55  ;;  %v495_v23 = vadd.f32 %v1697_v26, %v455_v5 }
 0x110   :  { %v155_v57 = vrot.slane %v154_v15, 2  ;;  %1195 = vmatmul.mubr.bf16.vlgmr.msra.gmra.mrb[0].mxu1 %v526_v53  ;;  %v321_v10 = vadd.f32 %v320_v54, %v1704_v38  ;;  %v176_v7 = vadd.f32 %v175_v47, %v128_v32  ;;  %v496_v2 = vadd.f32 %v1702_v44, %v456_v56 }
 0x111   :  { %v130_v22 = vpop.xlane.xlu0 %129  ;;  %1198 = vmatprep.mubr.bf16.mxu1 %v527_v19  ;;  %v248_v49 = vpop.xlane.xlu1 %247 }
 0x112   :  { %v156_v27 = vadd.f32 %v155_v57, %v154_v15  ;;  %v300_v61 = vadd.f32 %v299_v34, %v248_v49  ;;  %v322_v63 = vadd.f32 %v321_v10, %v272_v50  ;;  %v177_v40 = vadd.f32 %v176_v7, %v130_v22 }
 0x113   :  { %v528_v38 = vpack.c.bf16 %v496_v2, %v495_v23 }
 0x114   :  { %v157_v13 = vrot.slane %v156_v27, 1  ;;  %v301_v18 = vrot.slane %v300_v61, 4  ;;  %v323_v41 = vadd.f32 %v322_v63, %v274_v11 }
 0x115   :  { %v276_v17 = vpop.xlane.xlu0 %275  ;;  %v132_v31 = vpop.xlane.xlu1 %131 }
 0x116   :  { %v302_v45 = vadd.f32 %v301_v18, %v300_v61  ;;  %v178_v35 = vadd.f32 %v177_v40, %v132_v31  ;;  %v158_v32 = vadd.f32 %v157_v13, %v156_v27  ;;  %v324_v8 = vadd.f32 %v323_v41, %v276_v17 }
 0x118   :  { %v303_v12 = vrot.slane %v302_v45, 2  ;;  %v179_v60 = vrot.slane %v178_v35, 4  ;;  %1199 = vmatmul.mubr.bf16.gmra.mrb[4].mxu1 %v528_v38  ;;  %v334_v50 = vmul.f32 0.00015943877, %v158_v32 }
 0x119   :  { %v278_v20 = vpop.xlane.xlu0 %277  ;;  %v280_v48 = vpop.xlane.xlu1 %279 }
 0x11a   :  { %v304_v46 = vadd.f32 %v303_v12, %v302_v45  ;;  %v180_v21 = vadd.f32 %v179_v60, %v178_v35  ;;  %v325_v6 = vadd.f32 %v324_v8, %v278_v20  ;;  %v342_v5 = vmul.f32 %v334_v50, %v334_v50 }
 0x11b   :  { %v369_v18 = vsub.f32 %v1409_v29, %v334_v50  ;;  %v370_v17 = vsub.f32 %v1415_v30, %v334_v50  ;;  %v371_v31 = vsub.f32 %v1429_v33, %v334_v50  ;;  %v372_v41 = vsub.f32 %v1441_v37, %v334_v50 }
 0x11c   :  { %v305_v55 = vrot.slane %v304_v46, 1  ;;  %v181_v1 = vrot.slane %v180_v21, 2  ;;  %v326_v53 = vadd.f32 %v325_v6, %v280_v48  ;;  %v373_v35 = vsub.f32 %v1464_v43, %v334_v50 }
 0x11d   :  { %v374_v38 = vsub.f32 %v1485_v52, %v334_v50  ;;  %v375_v29 = vsub.f32 %v1504_v59, %v334_v50 }
 0x11e   :  { %v306_v28 = vadd.f32 %v305_v55, %v304_v46  ;;  %v182_v15 = vadd.f32 %v181_v1, %v180_v21  ;;  %v327_v11 = vrot.slane %v326_v53, 4  ;;  %v2514_v46 = vld [vmem:[#allocation10_spill] sm:$0xff] }
 0x11f   :  { %v376_v30 = vsub.f32 %v2514_v46, %v334_v50 }
 0x120   :  { %v338_v56 = vmul.f32 0.00015943877, %v306_v28  ;;  %v183_v54 = vrot.slane %v182_v15, 1  ;;  %v328_v47 = vadd.f32 %v327_v11, %v326_v53 }
 0x122   :  { %v346_v19 = vsub.f32 %v338_v56, %v342_v5  ;;  %v184_v57 = vadd.f32 %v183_v54, %v182_v15  ;;  %v329_v34 = vrot.slane %v328_v47, 2 }
 0x124   :  { %v350_v10 = vmax.f32 %v346_v19, 0.0  ;;  %v330_v7 = vadd.f32 %v329_v34, %v328_v47  ;;  %v1756_v49 = vmul.f32 0.00015943877, %v184_v57  ;;  %v2515_v19 = vld [vmem:[#allocation5_spill] sm:$0xff] }
 0x126   :  { %v354_v22 = vadd.f32 1e-05, %v350_v10  ;;  %v331_v27 = vrot.slane %v330_v7, 1  ;;  %v344_v23 = vmul.f32 %v1756_v49, %v1756_v49  ;;  %v385_v57 = vsub.f32 %v2515_v19, %v1756_v49  ;;  %v2516_v10 = vld [vmem:[#allocation6_spill] sm:$0xff] }
 0x128   :  { %1231 = vrsqrt.f32 %v354_v22  ;;  %v332_v61 = vadd.f32 %v331_v27, %v330_v7  ;;  %v386_v7 = vsub.f32 %v2516_v10, %v1756_v49  ;;  %v2517_v22 = vld [vmem:[#allocation7_spill] sm:$0xff]  ;;  %v850_v10 = vstv %s1102_s27 }
 0x129   :  { %v387_v27 = vsub.f32 %v2517_v22, %v1756_v49  ;;  %v931_v22 = vstv %s1114_s28 }
 0x12a   :  { %v340_v2 = vmul.f32 0.00015943877, %v332_v61  ;;  %v2518_v61 = vld [vmem:[#allocation8_spill] sm:$0xff] }
 0x12c   :  { %v348_v63 = vsub.f32 %v340_v2, %v344_v23  ;;  %v388_v23 = vsub.f32 %v2518_v61, %v1756_v49  ;;  %v1842_v61 = vstv %s1100_s29 }
 0x12e   :  { %v352_v13 = vmax.f32 %v348_v63, 0.0  ;;  %v2519_v63 = vld [vmem:[#allocation9_spill] sm:$0xff] }
 0x130   :  { %v356_v40 = vadd.f32 1e-05, %v352_v13  ;;  %v389_v13 = vsub.f32 %v2519_v63, %v1756_v49  ;;  %v1847_v63 = vstv %s1116_s7 }
 0x132   :  { %v1232_v45 = vpop.eup %1231  ;;  %1233 = vrsqrt.f32 %v356_v40  ;;  %v2520_v40 = vld [vmem:[#allocation11_spill] sm:$0xff] }
 0x133   :  { %v401_v32 = vmul.f32 %v1232_v45, %v369_v18  ;;  %v402_v12 = vmul.f32 %v1232_v45, %v370_v17  ;;  %v403_v8 = vmul.f32 %v1232_v45, %v371_v31  ;;  %v404_v60 = vmul.f32 %v1232_v45, %v372_v41  ;;  %v2521_v17 = vld [vmem:[#allocation12_spill] sm:$0xff]  ;;  %v2522_v41 = vld [vmem:[#allocation13_spill] sm:$0xff] }
 0x134   :  { %v405_v20 = vmul.f32 %v1232_v45, %v373_v35  ;;  %v406_v48 = vmul.f32 %v1232_v45, %v374_v38  ;;  %v407_v55 = vmul.f32 %v1232_v45, %v375_v29  ;;  %v408_v1 = vmul.f32 %v1232_v45, %v376_v30 }
 0x135   :  { %v441_v33 = vmul.f32 %v1593_v24, %v401_v32  ;;  %v442_v37 = vmul.f32 %v1604_v3, %v402_v12  ;;  %v443_v21 = vmul.f32 %v1609_v36, %v403_v8  ;;  %v444_v43 = vmul.f32 %v1614_v0, %v404_v60 }
 0x136   :  { %v445_v52 = vmul.f32 %v1630_v42, %v405_v20  ;;  %v446_v6 = vmul.f32 %v1635_v14, %v406_v48  ;;  %v447_v54 = vmul.f32 %v1681_v39, %v407_v55  ;;  %v448_v47 = vmul.f32 %v1688_v9, %v408_v1 }
 0x137   :  { %v481_v53 = vadd.f32 %v1625_v62, %v441_v33  ;;  %v482_v59 = vadd.f32 %v1642_v51, %v442_v37  ;;  %v483_v50 = vadd.f32 %v1647_v4, %v443_v21  ;;  %v484_v28 = vadd.f32 %v1652_v58, %v444_v43 }
 0x138   :  { %v485_v15 = vadd.f32 %v1665_v16, %v445_v52  ;;  %v486_v11 = vadd.f32 %v1670_v25, %v446_v6  ;;  %v390_v18 = vsub.f32 %v2520_v40, %v1756_v49  ;;  %v391_v31 = vsub.f32 %v2521_v17, %v1756_v49 }
 0x139   :  { %v521_v5 = vpack.c.bf16 %v482_v59, %v481_v53  ;;  %v522_v56 = vpack.c.bf16 %v484_v28, %v483_v50  ;;  %v392_v45 = vsub.f32 %v2522_v41, %v1756_v49  ;;  %v487_v8 = vadd.f32 %v1697_v26, %v447_v54 }
 0x13a   :  { %v523_v34 = vpack.c.bf16 %v486_v11, %v485_v15  ;;  %v488_v60 = vadd.f32 %v1702_v44, %v448_v47  ;;  %v1851_v40 = vstv %s1099_s9  ;;  %v1855_v17 = vstv %s1115_s11 }
 0x13b   :  { %1186 = vmatprep.mubr.bf16.mxu0 %v521_v5 }
 0x13c   :  { %v1234_v2 = vpop.eup %1233  ;;  %1187 = vmatmul.mubr.bf16.gmra.mrb[8].mxu0 %v522_v56  ;;  %v524_v1 = vpack.c.bf16 %v488_v60, %v487_v8  ;;  %v1871_v60 = vstv %s1129_s15 }
 0x13d   :  { %1190 = vmatprep.mubr.bf16.mxu0 %v523_v34  ;;  %v417_v35 = vmul.f32 %v1234_v2, %v385_v57  ;;  %v418_v38 = vmul.f32 %v1234_v2, %v386_v7  ;;  %v419_v32 = vmul.f32 %v1234_v2, %v387_v27  ;;  %v420_v12 = vmul.f32 %v1234_v2, %v388_v23  ;;  %v1839_v57 = vld [vmem:[%s2494_s5] ss:$0 sm:$0xff] }
 0x13e   :  { %v421_v20 = vmul.f32 %v1234_v2, %v389_v13  ;;  %v422_v48 = vmul.f32 %v1234_v2, %v390_v18  ;;  %v423_v21 = vmul.f32 %v1234_v2, %v391_v31  ;;  %v424_v43 = vmul.f32 %v1234_v2, %v392_v45 }
 0x13f   :  { %v457_v29 = vmul.f32 %v1593_v24, %v417_v35  ;;  %v458_v46 = vmul.f32 %v1604_v3, %v418_v38  ;;  %v459_v30 = vmul.f32 %v1609_v36, %v419_v32  ;;  %v460_v33 = vmul.f32 %v1614_v0, %v420_v12 }
 0x140   :  { %v461_v49 = vmul.f32 %v1630_v42, %v421_v20  ;;  %v462_v37 = vmul.f32 %v1635_v14, %v422_v48  ;;  %v463_v42 = vmul.f32 %v1681_v39, %v423_v21  ;;  %v464_v14 = vmul.f32 %v1688_v9, %v424_v43 }
 0x141   :  { %v497_v52 = vadd.f32 %v1625_v62, %v457_v29  ;;  %v498_v6 = vadd.f32 %v1642_v51, %v458_v46  ;;  %v499_v55 = vadd.f32 %v1647_v4, %v459_v30  ;;  %v500_v24 = vadd.f32 %v1652_v58, %v460_v33 }
 0x142   :  { %v501_v3 = vadd.f32 %v1665_v16, %v461_v49  ;;  %v502_v36 = vadd.f32 %v1670_v25, %v462_v37  ;;  %v503_v51 = vadd.f32 %v1697_v26, %v463_v42  ;;  %v504_v4 = vadd.f32 %v1702_v44, %v464_v14 }
 0x143   :  { %v529_v0 = vpack.c.bf16 %v498_v6, %v497_v52  ;;  %v530_v53 = vpack.c.bf16 %v500_v24, %v499_v55  ;;  %v770_v34 = vstv %s769_s3  ;;  %v1012_v27 = vstv %s1126_s0 }
 0x144   :  { %1191 = vmatmul.mubr.bf16.gmra.mrb[12].mxu0 %v524_v1  ;;  %v531_v62 = vpack.c.bf16 %v502_v36, %v501_v3  ;;  %v532_v58 = vpack.c.bf16 %v504_v4, %v503_v51  ;;  %v1845_v2 = vstv %s1104_s30  ;;  %v1849_v13 = vstv %s1128_s8 }
 0x145   :  { %1202 = vmatprep.mubr.bf16.mxu1 %v529_v0  ;;  %v1853_v18 = vstv %s1103_s10  ;;  %v1857_v31 = vstv %s1127_s12  ;;  %v1860_v45 = vstv %s1101_s13  ;;  %v1862_v35 = vstv %s1105_s14 }
 0x146   :  { %1203 = vmatmul.mubr.bf16.gmra.mrb[8].mxu1 %v530_v53  ;;  %v1864_v38 = vstv %s1117_s4 }
 0x147   :  { %1206 = vmatprep.mubr.bf16.mxu1 %v531_v62 }
 0x14e   :  { %1207 = vmatmul.mubr.bf16.gmra.mrb[12].mxu1 %v532_v58 }
 0x1cf   :  { %v1180_v16 = vpop.f32.mrb[0].mxu0 }
 0x1d0   :  { %v567_v59 = vpop.f32.mrb[1].mxu0  ;;  %v703_v7 = vmul.f32 %v1180_v16, %v1839_v57 }
 0x1d1   :  { %v1181_v25 = vpop.f32.mrb[2].mxu0  ;;  %v701_v23 = vmul.f32 %v1839_v57, %v567_v59 }
 0x1d2   :  { %v570_v50 = vpop.f32.mrb[3].mxu0  ;;  %v704_v41 = vmul.f32 %v1181_v25, %v1839_v57  ;;  %v1866_v32 = vmul.f32 %v770_v34, %v703_v7  ;;  %v1868_v12 = vmul.f32 %v850_v10, %v703_v7  ;;  %v1873_v20 = vmul.f32 %v931_v22, %v703_v7 }
 0x1d3   :  { %v702_v8 = vmul.f32 %v1839_v57, %v570_v50  ;;  %v1875_v48 = vmul.f32 %v1012_v27, %v703_v7  ;;  %v1877_v29 = vmul.f32 %v770_v34, %v701_v23  ;;  %v1880_v30 = vmul.f32 %v850_v10, %v701_v23 }
 0x1d4   :  { %v1882_v33 = vmul.f32 %v931_v22, %v701_v23  ;;  %v1884_v49 = vmul.f32 %v1012_v27, %v701_v23  ;;  %v1887_v21 = vmul.f32 %v770_v34, %v704_v41  ;;  %v1889_v43 = vmul.f32 %v850_v10, %v704_v41 }
 0x1d5   :  { %v1891_v52 = vmul.f32 %v931_v22, %v704_v41  ;;  %v1893_v6 = vmul.f32 %v1012_v27, %v704_v41  ;;  %v1895_v55 = vmul.f32 %v770_v34, %v702_v8  ;;  %v1897_v24 = vmul.f32 %v850_v10, %v702_v8 }
 0x1d6   :  { %v1899_v1 = vmul.f32 %v931_v22, %v702_v8  ;;  %v1903_v36 = vmul.f32 %v1012_v27, %v702_v8 }
 0x1d7   :  { %v1184_v28 = vpop.f32.mrb[4].mxu0 }
 0x1d8   :  { %v583_v15 = vpop.f32.mrb[5].mxu0  ;;  %v707_v46 = vmul.f32 %v1184_v28, %v1839_v57 }
 0x1d9   :  { %v1816_v11 = vpop.f32.mrb[6].mxu0  ;;  %v705_v37 = vmul.f32 %v1839_v57, %v583_v15 }
 0x1da   :  { %v1818_v39 = vpop.f32.mrb[7].mxu0  ;;  %v708_v3 = vmul.f32 %v1816_v11, %v1839_v57  ;;  %v1905_v0 = vmul.f32 %v770_v34, %v707_v46  ;;  %v1907_v53 = vmul.f32 %v850_v10, %v707_v46  ;;  %v1911_v14 = vmul.f32 %v931_v22, %v707_v46 }
 0x1db   :  { %v706_v42 = vmul.f32 %v1839_v57, %v1818_v39  ;;  %v1913_v62 = vmul.f32 %v1012_v27, %v707_v46  ;;  %v1915_v51 = vmul.f32 %v770_v34, %v705_v37  ;;  %v1919_v58 = vmul.f32 %v850_v10, %v705_v37 }
 0x1dc   :  { %v1921_v16 = vmul.f32 %v931_v22, %v705_v37  ;;  %v1923_v59 = vmul.f32 %v1012_v27, %v705_v37  ;;  %v1927_v50 = vmul.f32 %v770_v34, %v708_v3  ;;  %v1929_v28 = vmul.f32 %v850_v10, %v708_v3 }
 0x1dd   :  { %v1931_v15 = vmul.f32 %v931_v22, %v708_v3  ;;  %v1933_v11 = vmul.f32 %v1012_v27, %v708_v3  ;;  %v1935_v39 = vmul.f32 %v770_v34, %v706_v42  ;;  %v1939_v7 = vmul.f32 %v931_v22, %v706_v42 }
 0x1de   :  { %v1943_v41 = vmul.f32 %v1012_v27, %v706_v42 }
 0x1df   :  { %2523 = vst [vmem:[#allocation10_spill] sm:$0xff] %v1931_v15  ;;  %2524 = vst [vmem:[#allocation5_spill] sm:$0xff] %v1933_v11 }
 0x1e0   :  { %2525 = vst [vmem:[#allocation6_spill] sm:$0xff] %v1935_v39  ;;  %2527 = vst [vmem:[#allocation8_spill] sm:$0xff] %v1939_v7 }
 0x1e1   :  { %2528 = vst [vmem:[#allocation9_spill] sm:$0xff] %v1943_v41 }
 0x1e3   :  { %v1820_v9 = vpop.f32.mrb[0].mxu1 }
 0x1e4   :  { %v1822_v5 = vpop.f32.mrb[1].mxu1  ;;  %v719_v4 = vmul.f32 %v1820_v9, %v1839_v57  ;;  %v1937_v9 = vmul.f32 %v850_v10, %v706_v42 }
 0x1e5   :  { %v1824_v56 = vpop.f32.mrb[2].mxu1  ;;  %v717_v25 = vmul.f32 %v1839_v57, %v1822_v5 }
 0x1e6   :  { %v1826_v26 = vpop.f32.mrb[3].mxu1  ;;  %2526 = vst [vmem:[#allocation7_spill] sm:$0xff] %v1937_v9  ;;  %v720_v23 = vmul.f32 %v1824_v56, %v1839_v57  ;;  %v801_v5 = vmul.f32 %v1842_v61, %v719_v4  ;;  %v881_v8 = vmul.f32 %v1845_v2, %v719_v4  ;;  %v962_v37 = vmul.f32 %v1847_v63, %v719_v4 }
 0x1e7   :  { %v718_v46 = vmul.f32 %v1839_v57, %v1826_v26  ;;  %v1043_v34 = vmul.f32 %v1849_v13, %v719_v4  ;;  %v799_v10 = vmul.f32 %v1842_v61, %v717_v25  ;;  %v879_v56 = vmul.f32 %v1845_v2, %v717_v25 }
 0x1e8   :  { %v1956_v27 = vmul.f32 %v1847_v63, %v717_v25  ;;  %v1959_v3 = vmul.f32 %v1849_v13, %v717_v25  ;;  %v1964_v42 = vmul.f32 %v1842_v61, %v720_v23  ;;  %v1967_v4 = vmul.f32 %v1845_v2, %v720_v23 }
 0x1e9   :  { %v1970_v41 = vmul.f32 %v1847_v63, %v720_v23  ;;  %v1975_v7 = vmul.f32 %v1849_v13, %v720_v23  ;;  %v1978_v25 = vmul.f32 %v1842_v61, %v718_v46 }
 0x1ea   :  { %2529 = vst [vmem:[#allocation11_spill] sm:$0xff] %v1964_v42  ;;  %2530 = vst [vmem:[#allocation12_spill] sm:$0xff] %v1967_v4  ;;  %v1986_v4 = vmul.f32 %v1847_v63, %v718_v46 }
 0x1eb   :  { %v1828_v44 = vpop.f32.mrb[4].mxu1  ;;  %2531 = vst [vmem:[#allocation13_spill] sm:$0xff] %v1970_v41  ;;  %2532 = vst [vmem:[#allocation14_spill] sm:$0xff] %v1975_v7  ;;  %v1989_v41 = vmul.f32 %v1849_v13, %v718_v46 }
 0x1ec   :  { %v1830_v54 = vpop.f32.mrb[5].mxu1  ;;  %v723_v22 = vmul.f32 %v1828_v44, %v1839_v57  ;;  %2533 = vst [vmem:[#allocation15_spill] sm:$0xff] %v1978_v25  ;;  %2535 = vst [vmem:[#allocation17_spill] sm:$0xff] %v1986_v4 }
 0x1ed   :  { %v1832_v47 = vpop.f32.mrb[6].mxu1  ;;  %v721_v26 = vmul.f32 %v1839_v57, %v1830_v54  ;;  %v1981_v54 = vmul.f32 %v1845_v2, %v718_v46  ;;  %2536 = vst [vmem:[#allocation18_spill] sm:$0xff] %v1989_v41 }
 0x1ee   :  { %v1834_v19 = vpop.f32.mrb[7].mxu1  ;;  %v724_v44 = vmul.f32 %v1832_v47, %v1839_v57  ;;  %v1992_v47 = vmul.f32 %v1842_v61, %v723_v22  ;;  %v1995_v23 = vmul.f32 %v1845_v2, %v723_v22  ;;  %v1998_v25 = vmul.f32 %v1847_v63, %v723_v22 }
 0x1ef   :  { %2534 = vst [vmem:[#allocation16_spill] sm:$0xff] %v1981_v54  ;;  %v722_v42 = vmul.f32 %v1839_v57, %v1834_v19  ;;  %v2001_v54 = vmul.f32 %v1849_v13, %v723_v22  ;;  %v2004_v19 = vmul.f32 %v1842_v61, %v721_v26  ;;  %v2007_v4 = vmul.f32 %v1845_v2, %v721_v26 }
 0x1f0   :  { %2537 = vst [vmem:[#allocation19_spill] sm:$0xff] %v1992_v47  ;;  %2538 = vst [vmem:[#allocation20_spill] sm:$0xff] %v1995_v23  ;;  %v2010_v46 = vmul.f32 %v1847_v63, %v721_v26  ;;  %v2013_v47 = vmul.f32 %v1849_v13, %v721_v26  ;;  %v2016_v23 = vmul.f32 %v1842_v61, %v724_v44 }
 0x1f1   :  { %2539 = vst [vmem:[#allocation21_spill] sm:$0xff] %v1998_v25  ;;  %2540 = vst [vmem:[#allocation22_spill] sm:$0xff] %v2001_v54  ;;  %v2019_v25 = vmul.f32 %v1845_v2, %v724_v44  ;;  %v2022_v54 = vmul.f32 %v1847_v63, %v724_v44 }
 0x1f2   :  { %2541 = vst [vmem:[#allocation23_spill] sm:$0xff] %v2004_v19  ;;  %2542 = vst [vmem:[#allocation24_spill] sm:$0xff] %v2007_v4  ;;  %v2025_v19 = vmul.f32 %v1849_v13, %v724_v44  ;;  %v2028_v4 = vmul.f32 %v1842_v61, %v722_v42 }
 0x1f3   :  { %2543 = vst [vmem:[#allocation25_spill] sm:$0xff] %v2010_v46  ;;  %2544 = vst [vmem:[#allocation26_spill] sm:$0xff] %v2013_v47  ;;  %v2032_v47 = vmul.f32 %v1845_v2, %v722_v42 }
 0x1f4   :  { %2545 = vst [vmem:[#allocation27_spill] sm:$0xff] %v2016_v23  ;;  %2546 = vst [vmem:[#allocation28_spill] sm:$0xff] %v2019_v25  ;;  %v2035_v23 = vmul.f32 %v1847_v63, %v722_v42  ;;  %v2038_v25 = vmul.f32 %v1849_v13, %v722_v42 }
 0x1f5   :  { %2547 = vst [vmem:[#allocation29_spill] sm:$0xff] %v2022_v54  ;;  %2548 = vst [vmem:[#allocation30_spill] sm:$0xff] %v2025_v19 }
 0x1f6   :  { %2549 = vst [vmem:[#allocation31_spill] sm:$0xff] %v2028_v4  ;;  %2550 = vst [vmem:[#allocation32_spill] sm:$0xff] %v2032_v47 }
 0x1f7   :  { %2551 = vst [vmem:[#allocation33_spill] sm:$0xff] %v2035_v23  ;;  %2552 = vst [vmem:[#allocation34_spill] sm:$0xff] %v2038_v25 }
 0x20f   :  { %v1188_v22 = vpop.f32.mrb[8].mxu0 }
 0x210   :  { %v711_v46 = vmul.f32 %v1188_v22, %v1839_v57  ;;  %v599_v26 = vpop.f32.mrb[9].mxu0 }
 0x211   :  { %v709_v54 = vmul.f32 %v1839_v57, %v599_v26  ;;  %v1189_v41 = vpop.f32.mrb[10].mxu0 }
 0x212   :  { %v783_v44 = vmul.f32 %v1851_v40, %v711_v46  ;;  %v863_v61 = vmul.f32 %v1853_v18, %v711_v46  ;;  %v944_v4 = vmul.f32 %v1855_v17, %v711_v46  ;;  %v1025_v22 = vmul.f32 %v1857_v31, %v711_v46  ;;  %v602_v19 = vpop.f32.mrb[11].mxu0 }
 0x213   :  { %v781_v2 = vmul.f32 %v1851_v40, %v709_v54  ;;  %v861_v63 = vmul.f32 %v1853_v18, %v709_v54  ;;  %v942_v23 = vmul.f32 %v1855_v17, %v709_v54  ;;  %v1023_v13 = vmul.f32 %v1857_v31, %v709_v54 }
 0x214   :  { %v791_v42 = vadd.f32 %v783_v44, %v1866_v32  ;;  %v871_v26 = vadd.f32 %v863_v61, %v1868_v12  ;;  %v952_v25 = vadd.f32 %v944_v4, %v1873_v20  ;;  %v1033_v47 = vadd.f32 %v1025_v22, %v1875_v48 }
 0x215   :  { %v789_v7 = vadd.f32 %v781_v2, %v1877_v29  ;;  %v869_v46 = vadd.f32 %v861_v63, %v1880_v30  ;;  %v950_v9 = vadd.f32 %v942_v23, %v1882_v33  ;;  %v1031_v39 = vadd.f32 %v1023_v13, %v1884_v49 }
 0x216   :  { %v712_v11 = vmul.f32 %v1189_v41, %v1839_v57  ;;  %v710_v54 = vmul.f32 %v1839_v57, %v602_v19  ;;  %v2059_v15 = vadd.f32 %v801_v5, %v791_v42  ;;  %v2061_v32 = vadd.f32 %v881_v8, %v871_v26 }
 0x217   :  { %v1192_v12 = vpop.f32.mrb[12].mxu0  ;;  %v2063_v20 = vadd.f32 %v962_v37, %v952_v25  ;;  %v2065_v48 = vadd.f32 %v1043_v34, %v1033_v47  ;;  %v2067_v29 = vadd.f32 %v799_v10, %v789_v7  ;;  %v2069_v30 = vadd.f32 %v879_v56, %v869_v46 }
 0x218   :  { %v784_v33 = vmul.f32 %v1851_v40, %v712_v11  ;;  %v864_v49 = vmul.f32 %v1853_v18, %v712_v11  ;;  %v945_v41 = vmul.f32 %v1855_v17, %v712_v11  ;;  %v1026_v5 = vmul.f32 %v1857_v31, %v712_v11  ;;  %v615_v4 = vpop.f32.mrb[13].mxu0 }
 0x219   :  { %v782_v8 = vmul.f32 %v1851_v40, %v710_v54  ;;  %v862_v37 = vmul.f32 %v1853_v18, %v710_v54  ;;  %v943_v34 = vmul.f32 %v1855_v17, %v710_v54  ;;  %v1024_v7 = vmul.f32 %v1857_v31, %v710_v54  ;;  %v1193_v10 = vpop.f32.mrb[14].mxu0  ;;  %v1204_v56 = vpop.f32.mrb[8].mxu1 }
 0x21a   :  { %v2080_v25 = vadd.f32 %v784_v33, %v1887_v21  ;;  %v2083_v47 = vadd.f32 %v864_v49, %v1889_v43  ;;  %v2086_v23 = vadd.f32 %v945_v41, %v1891_v52  ;;  %v2089_v11 = vadd.f32 %v1026_v5, %v1893_v6  ;;  %v618_v19 = vpop.f32.mrb[15].mxu0  ;;  %v663_v44 = vpop.f32.mrb[9].mxu1 }
 0x21b   :  { %v2092_v61 = vadd.f32 %v782_v8, %v1895_v55  ;;  %v2095_v22 = vadd.f32 %v862_v37, %v1897_v24  ;;  %v2098_v21 = vadd.f32 %v943_v34, %v1899_v1  ;;  %v2101_v43 = vadd.f32 %v1024_v7, %v1903_v36  ;;  %v2103_v2 = vpop.f32.mrb[10].mxu1 }
 0x21c   :  { %v715_v52 = vmul.f32 %v1192_v12, %v1839_v57  ;;  %v713_v6 = vmul.f32 %v1839_v57, %v615_v4  ;;  %v716_v63 = vmul.f32 %v1193_v10, %v1839_v57  ;;  %v727_v55 = vmul.f32 %v1204_v56, %v1839_v57  ;;  %v2109_v13 = vpop.f32.mrb[11].mxu1 }
 0x21d   :  { %v714_v24 = vmul.f32 %v1839_v57, %v618_v19  ;;  %v2113_v1 = vmul.f32 %v1839_v57, %v663_v44  ;;  %v2116_v36 = vadd.f32 %v1956_v27, %v950_v9  ;;  %v2119_v42 = vadd.f32 %v1959_v3, %v1031_v39 }
 0x21e   :  { %v787_v26 = vmul.f32 %v1851_v40, %v715_v52  ;;  %v867_v46 = vmul.f32 %v1853_v18, %v715_v52  ;;  %v948_v54 = vmul.f32 %v1855_v17, %v715_v52  ;;  %v1029_v12 = vmul.f32 %v1857_v31, %v715_v52 }
 0x21f   :  { %v785_v33 = vmul.f32 %v1851_v40, %v713_v6  ;;  %v865_v49 = vmul.f32 %v1853_v18, %v713_v6  ;;  %v946_v41 = vmul.f32 %v1855_v17, %v713_v6  ;;  %v1027_v9 = vmul.f32 %v1857_v31, %v713_v6  ;;  %v2553_v6 = vld [vmem:[#allocation10_spill] sm:$0xff] }
 0x220   :  { %v2130_v27 = vadd.f32 %v787_v26, %v1905_v0  ;;  %v2133_v39 = vadd.f32 %v867_v46, %v1907_v53  ;;  %v2136_v3 = vadd.f32 %v948_v54, %v1911_v14  ;;  %v2139_v5 = vadd.f32 %v1029_v12, %v1913_v62  ;;  %v2554_v26 = vld [vmem:[#allocation5_spill] sm:$0xff]  ;;  %v747_v54 = vld [vmem:[%s2490_s1 + $0x50] sm:$0xff] }
 0x221   :  { %v2142_v4 = vadd.f32 %v785_v33, %v1915_v51  ;;  %v2145_v8 = vadd.f32 %v865_v49, %v1919_v58  ;;  %v2148_v37 = vadd.f32 %v946_v41, %v1921_v16  ;;  %v2151_v0 = vadd.f32 %v1027_v9, %v1923_v59  ;;  %v2153_v53 = vpop.f32.mrb[12].mxu1  ;;  %v739_v58 = vld [vmem:[%s2490_s1 + $0x10] sm:$0xff] }
 0x222   :  { %v788_v14 = vmul.f32 %v1851_v40, %v716_v63  ;;  %v868_v34 = vmul.f32 %v1853_v18, %v716_v63  ;;  %v949_v62 = vmul.f32 %v1855_v17, %v716_v63  ;;  %v1030_v51 = vmul.f32 %v1857_v31, %v716_v63  ;;  %v2159_v7 = vpop.f32.mrb[13].mxu1 }
 0x223   :  { %v819_v16 = vmul.f32 %v1860_v45, %v727_v55  ;;  %v899_v59 = vmul.f32 %v1862_v35, %v727_v55  ;;  %v980_v10 = vmul.f32 %v1864_v38, %v727_v55  ;;  %v1061_v56 = vmul.f32 %v1871_v60, %v727_v55  ;;  %v2168_v19 = vpop.f32.mrb[14].mxu1  ;;  %v755_v55 = vld [vmem:[%s2490_s1 + $0x90] sm:$0xff] }
 0x224   :  { %v2171_v44 = vadd.f32 %v788_v14, %v1927_v50  ;;  %v2174_v52 = vadd.f32 %v868_v34, %v1929_v28  ;;  %v2177_v63 = vadd.f32 %v949_v62, %v2553_v6  ;;  %v2180_v46 = vadd.f32 %v1030_v51, %v2554_v26  ;;  %v763_v50 = vld [vmem:[%s2490_s1 + $0xd0] sm:$0xff]  ;;  %v2191_v28 = vpop.f32.mrb[15].mxu1 }
 0x225   :  { %2556 = vst [vmem:[#allocation5_spill] sm:$0xff] %v2191_v28  ;;  %v827_v12 = vadd.f32 %v819_v16, %v2059_v15  ;;  %v907_v33 = vadd.f32 %v899_v59, %v2061_v32  ;;  %v988_v49 = vadd.f32 %v980_v10, %v2063_v20  ;;  %v1069_v41 = vadd.f32 %v1061_v56, %v2065_v48  ;;  %v2558_v32 = vld [vmem:[#allocation7_spill] sm:$0xff]  ;;  %v2559_v20 = vld [vmem:[#allocation8_spill] sm:$0xff]  ;;  %v745_v10 = vld [vmem:[%s2490_s1 + $0x40] sm:$0xff] }
 0x226   :  { %2555 = vst [vmem:[#allocation10_spill] sm:$0xff] %v2180_v46  ;;  %v786_v9 = vmul.f32 %v1851_v40, %v714_v24  ;;  %v866_v14 = vmul.f32 %v1853_v18, %v714_v24  ;;  %v947_v34 = vmul.f32 %v1855_v17, %v714_v24  ;;  %v1028_v62 = vmul.f32 %v1857_v31, %v714_v24  ;;  %v2557_v46 = vld [vmem:[#allocation6_spill] sm:$0xff]  ;;  %v2560_v40 = vld [vmem:[#allocation9_spill] sm:$0xff] }
 0x227   :  { %v835_v51 = vadd.f32 %v827_v12, %v739_v58  ;;  %v915_v6 = vadd.f32 %v907_v33, %v747_v54  ;;  %v996_v26 = vadd.f32 %v988_v49, %v755_v55  ;;  %v1077_v28 = vadd.f32 %v1069_v41, %v763_v50  ;;  %v737_v18 = vld [vmem:[%s2490_s1] sm:$0xff]  ;;  %v2561_v55 = vld [vmem:[#allocation11_spill] sm:$0xff] }
 0x228   :  { %v2202_v15 = vadd.f32 %v786_v9, %v2557_v46  ;;  %v2205_v16 = vadd.f32 %v866_v14, %v2558_v32  ;;  %v2208_v48 = vadd.f32 %v947_v34, %v2559_v20  ;;  %v2211_v59 = vadd.f32 %v1028_v62, %v2560_v40  ;;  %v753_v56 = vld [vmem:[%s2490_s1 + $0x80] sm:$0xff]  ;;  %v2564_v62 = vld [vmem:[#allocation14_spill] sm:$0xff]  ;;  %v764_v40 = vld [vmem:[%s2490_s1 + $0xd8] sm:$0xff] }
 0x229   :  { %843 = vst [vmem:[%s2495_s6 + $0x10] sm:$0xff] %v835_v51  ;;  %1108 = vst [vmem:[%s2495_s6 + $0x50] sm:$0xff] %v915_v6  ;;  %v817_v17 = vmul.f32 %v1860_v45, %v2113_v1  ;;  %v897_v31 = vmul.f32 %v1862_v35, %v2113_v1  ;;  %v978_v24 = vmul.f32 %v1864_v38, %v2113_v1  ;;  %v761_v46 = vld [vmem:[%s2490_s1 + $0xc0] sm:$0xff] }
 0x22a   :  { %1120 = vst [vmem:[%s2495_s6 + $0x90] sm:$0xff] %v996_v26  ;;  %1132 = vst [vmem:[%s2495_s6 + $0xd0] sm:$0xff] %v1077_v28  ;;  %v1059_v58 = vmul.f32 %v1871_v60, %v2113_v1  ;;  %v728_v54 = vmul.f32 %v2103_v2, %v1839_v57  ;;  %v810_v50 = vadd.f32 %v2561_v55, %v2080_v25  ;;  %v2562_v1 = vld [vmem:[#allocation12_spill] sm:$0xff]  ;;  %v2563_v12 = vld [vmem:[#allocation13_spill] sm:$0xff] }
 0x22b   :  { %v890_v28 = vadd.f32 %v2562_v1, %v2083_v47  ;;  %v971_v33 = vadd.f32 %v2563_v12, %v2086_v23  ;;  %v825_v49 = vadd.f32 %v817_v17, %v2067_v29  ;;  %v905_v41 = vadd.f32 %v897_v31, %v2069_v30  ;;  %v740_v29 = vld [vmem:[%s2490_s1 + $0x18] sm:$0xff]  ;;  %v2565_v17 = vld [vmem:[#allocation15_spill] sm:$0xff] }
 0x22c   :  { %v986_v9 = vadd.f32 %v978_v24, %v2116_v36  ;;  %v1067_v14 = vadd.f32 %v1059_v58, %v2119_v42  ;;  %v820_v34 = vmul.f32 %v1860_v45, %v728_v54  ;;  %v900_v2 = vmul.f32 %v1862_v35, %v728_v54  ;;  %v748_v30 = vld [vmem:[%s2490_s1 + $0x58] sm:$0xff] }
 0x22d   :  { %v981_v25 = vmul.f32 %v1864_v38, %v728_v54  ;;  %v1052_v47 = vadd.f32 %v2564_v62, %v2089_v11  ;;  %v833_v51 = vadd.f32 %v825_v49, %v737_v18  ;;  %v913_v6 = vadd.f32 %v905_v41, %v745_v10  ;;  %v756_v36 = vld [vmem:[%s2490_s1 + $0x98] sm:$0xff]  ;;  %v2567_v10 = vld [vmem:[#allocation17_spill] sm:$0xff] }
 0x22e   :  { %v994_v23 = vadd.f32 %v986_v9, %v753_v56  ;;  %v1075_v26 = vadd.f32 %v1067_v14, %v761_v46  ;;  %v828_v42 = vadd.f32 %v820_v34, %v810_v50  ;;  %v908_v32 = vadd.f32 %v900_v2, %v890_v28  ;;  %v2566_v24 = vld [vmem:[#allocation16_spill] sm:$0xff]  ;;  %v2569_v9 = vld [vmem:[#allocation19_spill] sm:$0xff]  ;;  %v762_v34 = vld [vmem:[%s2490_s1 + $0xc8] sm:$0xff] }
 0x22f   :  { %v989_v20 = vadd.f32 %v981_v25, %v971_v33  ;;  %v1062_v11 = vmul.f32 %v1871_v60, %v728_v54  ;;  %841 = vst [vmem:[%s2495_s6] sm:$0xff] %v833_v51  ;;  %1106 = vst [vmem:[%s2495_s6 + $0x40] sm:$0xff] %v913_v6  ;;  %v726_v18 = vmul.f32 %v1839_v57, %v2109_v13  ;;  %v2568_v13 = vld [vmem:[#allocation18_spill] sm:$0xff] }
 0x230   :  { %1118 = vst [vmem:[%s2495_s6 + $0x80] sm:$0xff] %v994_v23  ;;  %1130 = vst [vmem:[%s2495_s6 + $0xc0] sm:$0xff] %v1075_v26  ;;  %v808_v31 = vadd.f32 %v2565_v17, %v2092_v61  ;;  %v888_v58 = vadd.f32 %v2566_v24, %v2095_v22  ;;  %v969_v56 = vadd.f32 %v2567_v10, %v2098_v21  ;;  %v738_v22 = vld [vmem:[%s2490_s1 + $0x8] sm:$0xff] }
 0x231   :  { %v836_v46 = vadd.f32 %v828_v42, %v740_v29  ;;  %v916_v54 = vadd.f32 %v908_v32, %v748_v30  ;;  %v997_v55 = vadd.f32 %v989_v20, %v756_v36  ;;  %v1070_v50 = vadd.f32 %v1062_v11, %v1052_v47  ;;  %v746_v21 = vld [vmem:[%s2490_s1 + $0x48] sm:$0xff]  ;;  %v2570_v47 = vld [vmem:[#allocation20_spill] sm:$0xff]  ;;  %v743_v42 = vld [vmem:[%s2490_s1 + $0x30] sm:$0xff] }
 0x232   :  { %v818_v1 = vmul.f32 %v1860_v45, %v726_v18  ;;  %v898_v28 = vmul.f32 %v1862_v35, %v726_v18  ;;  %v979_v12 = vmul.f32 %v1864_v38, %v726_v18  ;;  %v1050_v33 = vadd.f32 %v2568_v13, %v2101_v43  ;;  %v754_v43 = vld [vmem:[%s2490_s1 + $0x88] sm:$0xff]  ;;  %v759_v11 = vld [vmem:[%s2490_s1 + $0xb0] sm:$0xff] }
 0x233   :  { %844 = vst [vmem:[%s2495_s6 + $0x18] sm:$0xff] %v836_v46  ;;  %1109 = vst [vmem:[%s2495_s6 + $0x58] sm:$0xff] %v916_v54  ;;  %v1078_v61 = vadd.f32 %v1070_v50, %v764_v40  ;;  %v1060_v49 = vmul.f32 %v1871_v60, %v726_v18  ;;  %v731_v41 = vmul.f32 %v2153_v53, %v1839_v57  ;;  %v2572_v18 = vld [vmem:[#allocation22_spill] sm:$0xff] }
 0x234   :  { %1121 = vst [vmem:[%s2495_s6 + $0x98] sm:$0xff] %v997_v55  ;;  %v813_v14 = vadd.f32 %v2569_v9, %v2130_v27  ;;  %v826_v2 = vadd.f32 %v818_v1, %v808_v31  ;;  %v906_v25 = vadd.f32 %v898_v28, %v888_v58  ;;  %v987_v62 = vadd.f32 %v979_v12, %v969_v56  ;;  %v2571_v27 = vld [vmem:[#allocation21_spill] sm:$0xff]  ;;  %v767_v56 = vld [vmem:[%s2490_s1 + $0xf0] sm:$0xff]  ;;  %v2574_v55 = vld [vmem:[#allocation24_spill] sm:$0xff] }
 0x235   :  { %v893_v51 = vadd.f32 %v2570_v47, %v2133_v39  ;;  %1133 = vst [vmem:[%s2495_s6 + $0xd8] sm:$0xff] %v1078_v61  ;;  %v1068_v6 = vadd.f32 %v1060_v49, %v1050_v33  ;;  %v823_v53 = vmul.f32 %v1860_v45, %v731_v41  ;;  %v903_v23 = vmul.f32 %v1862_v35, %v731_v41  ;;  %v751_v39 = vld [vmem:[%s2490_s1 + $0x70] sm:$0xff]  ;;  %v2575_v1 = vld [vmem:[#allocation25_spill] sm:$0xff]  ;;  %v2576_v61 = vld [vmem:[#allocation26_spill] sm:$0xff] }
 0x236   :  { %v974_v26 = vadd.f32 %v2571_v27, %v2136_v3  ;;  %v834_v29 = vadd.f32 %v826_v2, %v738_v22  ;;  %v914_v30 = vadd.f32 %v906_v25, %v746_v21  ;;  %v995_v36 = vadd.f32 %v987_v62, %v754_v43  ;;  %v765_v9 = vld [vmem:[%s2490_s1 + $0xe0] sm:$0xff]  ;;  %v2578_v47 = vld [vmem:[#allocation28_spill] sm:$0xff] }
 0x237   :  { %v984_v32 = vmul.f32 %v1864_v38, %v731_v41  ;;  %v1076_v20 = vadd.f32 %v1068_v6, %v762_v34  ;;  %v831_v40 = vadd.f32 %v823_v53, %v813_v14  ;;  %v911_v3 = vadd.f32 %v903_v23, %v893_v51  ;;  %v2577_v34 = vld [vmem:[#allocation27_spill] sm:$0xff]  ;;  %v744_v23 = vld [vmem:[%s2490_s1 + $0x38] sm:$0xff] }
 0x238   :  { %v1055_v17 = vadd.f32 %v2572_v18, %v2139_v5  ;;  %842 = vst [vmem:[%s2495_s6 + $0x8] sm:$0xff] %v834_v29  ;;  %1107 = vst [vmem:[%s2495_s6 + $0x48] sm:$0xff] %v914_v30  ;;  %v1065_v24 = vmul.f32 %v1871_v60, %v731_v41  ;;  %v729_v58 = vmul.f32 %v1839_v57, %v2159_v7  ;;  %v2573_v5 = vld [vmem:[#allocation23_spill] sm:$0xff]  ;;  %v757_v41 = vld [vmem:[%s2490_s1 + $0xa0] sm:$0xff] }
 0x239   :  { %1119 = vst [vmem:[%s2495_s6 + $0x88] sm:$0xff] %v995_v36  ;;  %v992_v31 = vadd.f32 %v984_v32, %v974_v26  ;;  %v811_v10 = vadd.f32 %v2573_v5, %v2142_v4  ;;  %1131 = vst [vmem:[%s2495_s6 + $0xc8] sm:$0xff] %v1076_v20  ;;  %v839_v46 = vadd.f32 %v831_v40, %v743_v42  ;;  %v2580_v32 = vld [vmem:[#allocation10_spill] sm:$0xff] }
 0x23a   :  { %v919_v54 = vadd.f32 %v911_v3, %v751_v39  ;;  %v891_v50 = vadd.f32 %v2574_v55, %v2145_v8  ;;  %v972_v28 = vadd.f32 %v2575_v1, %v2148_v37  ;;  %v1073_v12 = vadd.f32 %v1065_v24, %v1055_v17  ;;  %v741_v8 = vld [vmem:[%s2490_s1 + $0x20] sm:$0xff]  ;;  %v2581_v20 = vld [vmem:[#allocation30_spill] sm:$0xff]  ;;  %v768_v17 = vld [vmem:[%s2490_s1 + $0xf8] sm:$0xff] }
 0x23b   :  { %v1000_v7 = vadd.f32 %v992_v31, %v759_v11  ;;  %v821_v4 = vmul.f32 %v1860_v45, %v729_v58  ;;  %v901_v13 = vmul.f32 %v1862_v35, %v729_v58  ;;  %847 = vst [vmem:[%s2495_s6 + $0x30] sm:$0xff] %v839_v46  ;;  %v749_v37 = vld [vmem:[%s2490_s1 + $0x60] sm:$0xff]  ;;  %v982_v33 = vmul.f32 %v1864_v38, %v729_v58  ;;  %v742_v1 = vld [vmem:[%s2490_s1 + $0x28] sm:$0xff] }
 0x23c   :  { %1112 = vst [vmem:[%s2495_s6 + $0x70] sm:$0xff] %v919_v54  ;;  %v1053_v22 = vadd.f32 %v2576_v61, %v2151_v0  ;;  %v1063_v21 = vmul.f32 %v1871_v60, %v729_v58  ;;  %v732_v43 = vmul.f32 %v2168_v19, %v1839_v57  ;;  %v1081_v49 = vadd.f32 %v1073_v12, %v767_v56  ;;  %v2582_v3 = vld [vmem:[#allocation5_spill] sm:$0xff]  ;;  %v2583_v58 = vld [vmem:[#allocation31_spill] sm:$0xff] }
 0x23d   :  { %1124 = vst [vmem:[%s2495_s6 + $0xb0] sm:$0xff] %v1000_v7  ;;  %v829_v14 = vadd.f32 %v821_v4, %v811_v10  ;;  %v909_v0 = vadd.f32 %v901_v13, %v891_v50  ;;  %v814_v2 = vadd.f32 %v2577_v34, %v2171_v44  ;;  %v990_v25 = vadd.f32 %v982_v33, %v972_v28  ;;  %v2579_v44 = vld [vmem:[#allocation29_spill] sm:$0xff]  ;;  %v2584_v10 = vld [vmem:[#allocation32_spill] sm:$0xff]  ;;  %v758_v4 = vld [vmem:[%s2490_s1 + $0xa8] sm:$0xff] }
 0x23e   :  { %v1071_v19 = vadd.f32 %v1063_v21, %v1053_v22  ;;  %v824_v62 = vmul.f32 %v1860_v45, %v732_v43  ;;  %v894_v51 = vadd.f32 %v2578_v47, %v2174_v52  ;;  %1136 = vst [vmem:[%s2495_s6 + $0xf0] sm:$0xff] %v1081_v49  ;;  %v904_v27 = vmul.f32 %v1862_v35, %v732_v43  ;;  %v752_v52 = vld [vmem:[%s2490_s1 + $0x78] sm:$0xff] }
 0x23f   :  { %v837_v6 = vadd.f32 %v829_v14, %v741_v8  ;;  %v917_v53 = vadd.f32 %v909_v0, %v749_v37  ;;  %v975_v26 = vadd.f32 %v2579_v44, %v2177_v63  ;;  %v998_v29 = vadd.f32 %v990_v25, %v757_v41  ;;  %v760_v63 = vld [vmem:[%s2490_s1 + $0xb8] sm:$0xff] }
 0x240   :  { %v1079_v30 = vadd.f32 %v1071_v19, %v765_v9  ;;  %v832_v36 = vadd.f32 %v824_v62, %v814_v2  ;;  %v985_v42 = vmul.f32 %v1864_v38, %v732_v43  ;;  %v912_v39 = vadd.f32 %v904_v27, %v894_v51 }
 0x241   :  { %845 = vst [vmem:[%s2495_s6 + $0x20] sm:$0xff] %v837_v6  ;;  %1110 = vst [vmem:[%s2495_s6 + $0x60] sm:$0xff] %v917_v53  ;;  %v1056_v11 = vadd.f32 %v2581_v20, %v2580_v32  ;;  %v1066_v40 = vmul.f32 %v1871_v60, %v732_v43  ;;  %v730_v18 = vmul.f32 %v1839_v57, %v2582_v3 }
 0x242   :  { %1122 = vst [vmem:[%s2495_s6 + $0xa0] sm:$0xff] %v998_v29  ;;  %1134 = vst [vmem:[%s2495_s6 + $0xe0] sm:$0xff] %v1079_v30  ;;  %v840_v31 = vadd.f32 %v832_v36, %v744_v23  ;;  %v993_v24 = vadd.f32 %v985_v42, %v975_v26  ;;  %v812_v5 = vadd.f32 %v2583_v58, %v2202_v15  ;;  %v750_v15 = vld [vmem:[%s2490_s1 + $0x68] sm:$0xff] }
 0x243   :  { %v892_v57 = vadd.f32 %v2584_v10, %v2205_v16  ;;  %v920_v56 = vadd.f32 %v912_v39, %v752_v52  ;;  %v1074_v46 = vadd.f32 %v1066_v40, %v1056_v11  ;;  %v822_v54 = vmul.f32 %v1860_v45, %v730_v18  ;;  %v2585_v16 = vld [vmem:[#allocation33_spill] sm:$0xff] }
 0x244   :  { %v902_v55 = vmul.f32 %v1862_v35, %v730_v18  ;;  %848 = vst [vmem:[%s2495_s6 + $0x38] sm:$0xff] %v840_v31  ;;  %v1001_v50 = vadd.f32 %v993_v24, %v760_v63  ;;  %v973_v28 = vadd.f32 %v2585_v16, %v2208_v48  ;;  %v983_v45 = vmul.f32 %v1864_v38, %v730_v18  ;;  %v2586_v35 = vld [vmem:[#allocation34_spill] sm:$0xff] }
 0x245   :  { %v1054_v7 = vadd.f32 %v2586_v35, %v2211_v59  ;;  %1113 = vst [vmem:[%s2495_s6 + $0x78] sm:$0xff] %v920_v56  ;;  %v1082_v12 = vadd.f32 %v1074_v46, %v768_v17  ;;  %v830_v13 = vadd.f32 %v822_v54, %v812_v5  ;;  %v1064_v37 = vmul.f32 %v1871_v60, %v730_v18  ;;  %v766_v38 = vld [vmem:[%s2490_s1 + $0xe8] sm:$0xff] }
 0x246   :  { %v910_v8 = vadd.f32 %v902_v55, %v892_v57  ;;  %1125 = vst [vmem:[%s2495_s6 + $0xb8] sm:$0xff] %v1001_v50  ;;  %v991_v48 = vadd.f32 %v983_v45, %v973_v28 }
 0x247   :  { %1137 = vst [vmem:[%s2495_s6 + $0xf8] sm:$0xff] %v1082_v12  ;;  %v838_v59 = vadd.f32 %v830_v13, %v742_v1  ;;  %v1072_v61 = vadd.f32 %v1064_v37, %v1054_v7 }
 0x248   :  { %v918_v33 = vadd.f32 %v910_v8, %v750_v15  ;;  %v999_v22 = vadd.f32 %v991_v48, %v758_v4 }
 0x249   :  { %846 = vst [vmem:[%s2495_s6 + $0x28] sm:$0xff] %v838_v59  ;;  %v1080_v60 = vadd.f32 %v1072_v61, %v766_v38 }
 0x24a   :  { %1111 = vst [vmem:[%s2495_s6 + $0x68] sm:$0xff] %v918_v33  ;;  %1123 = vst [vmem:[%s2495_s6 + $0xa8] sm:$0xff] %v999_v22 }
 0x24b   :  { %1135 = vst [vmem:[%s2495_s6 + $0xe8] sm:$0xff] %v1080_v60 }
 0x24c   :  { %1096 = vsyncpa [#allocation3], 1 }

</bundles_post_ra>
